<compile_context>
chip_gen: v6e
topology: v6e:2x2x1
jax: 0.10.0
libtpu: 0.0.40
codegen_flags: <defaults>
</compile_context>

<pallas_src>
import jax
import jax.numpy as jnp
from jax.experimental import pallas as pl
from jax.experimental.pallas import tpu as pltpu


# ------------------------- Helpers -------------------------

def _vmem_limit_bytes():
    """Generation-aware scoped-VMEM cap (~48 MiB on v7x, ~96-100 MiB on v5e/v6e)."""
    try:
        cap = pltpu.get_tpu_info().vmem_capacity_bytes
    except Exception:
        cap = 128 * 1024 * 1024
    return int(min(cap * 3 // 4, 100 * 1024 * 1024))


# ------------------------- Transformer layer stack -------------------------

def transformer_stack_kernel(x_ref, wqkv_ref, wo_ref, ff1_ref, ff2_ref, ln_ref,
                             out_ref, h_ref, acc_ref):
    """grid = (batch_chunk, layer, ff_tile).

    h_ref   : (Tc, D) f32 VMEM -- activation resident across all layers of this chunk.
    acc_ref : (Tc, D) f32 VMEM -- attention-context buffer at f==0, then FF accumulator.
    """
    l = pl.program_id(1)
    f = pl.program_id(2)
    n_layers = pl.num_programs(1)
    n_ff = pl.num_programs(2)

    Bc, S, D = out_ref.shape
    Tc = Bc * S
    tq = 128 if S % 128 == 0 else S            # query tile (exact softmax over full S row)

    # Load this batch chunk's embedded tokens once, at layer 0 / ff-tile 0.
    @pl.when((l == 0) & (f == 0))
    def _():
        h_ref[...] = x_ref[...].reshape(Tc, D).astype(jnp.float32)

    # ---------------- attention + residual + norm1 (first ff tile only) ----------------
    @pl.when(f == 0)
    def _():
        x2 = h_ref[...]                                        # (Tc, D) f32
        xb = x2.astype(jnp.bfloat16)

        # Fused QKV: one bf16 MXU push over the whole token slab of this chunk.
        # 1/sqrt(D) is folded into the Q columns at init time.
        qkv = jnp.dot(xb, wqkv_ref[...], preferred_element_type=jnp.float32)  # (Tc, 3D) f32

        # Query-tiled attention: live scores bounded to (tq, S); K/V stay VMEM-resident.
        # TODO(synk): stream KV tiles (full flash / online softmax) for very long S.
        for b in range(Bc):
            kb = qkv[b * S:(b + 1) * S, D:2 * D].astype(jnp.bfloat16)   # (S, D)
            vb = qkv[b * S:(b + 1) * S, 2 * D:].astype(jnp.bfloat16)    # (S, D)
            for qi in range(S // tq):
                r0 = b * S + qi * tq
                qt = qkv[r0:r0 + tq, :D].astype(jnp.bfloat16)           # (tq, D)
                s = jax.lax.dot_general(qt, kb, (((1,), (1,)), ((), ())),
                                        preferred_element_type=jnp.float32)  # (tq, S)
                s = s - jnp.max(s, axis=-1, keepdims=True)
                p = jnp.exp(s)
                p = p * pl.reciprocal(jnp.sum(p, axis=-1, keepdims=True), approx=True)
                acc_ref[r0:r0 + tq, :] = jnp.dot(p.astype(jnp.bfloat16), vb,
                                                 preferred_element_type=jnp.float32)

        ctx = acc_ref[...]                                     # (Tc, D) f32
        o = jnp.dot(ctx.astype(jnp.bfloat16), wo_ref[...],
                    preferred_element_type=jnp.float32)

        ln = ln_ref[...]                                       # (4, D) f32
        g1, b1 = ln[0:1, :], ln[1:2, :]
        h = x2 + o                                             # residual, f32
        mu = jnp.mean(h, axis=-1, keepdims=True)
        var = jnp.mean((h - mu) ** 2, axis=-1, keepdims=True)
        h_ref[...] = (h - mu) * jax.lax.rsqrt(var + 1e-5) * g1 + b1

    # ---------------- feed-forward, tiled over d_ff (f32 accumulation) -----------------
    h1b = h_ref[...].astype(jnp.bfloat16)                      # post-norm1 activations
    hid = jnp.maximum(jnp.dot(h1b, ff1_ref[...],
                              preferred_element_type=jnp.float32), 0.0)
    contrib = jnp.dot(hid.astype(jnp.bfloat16), ff2_ref[...],
                      preferred_element_type=jnp.float32)

    @pl.when(f == 0)
    def _():
        acc_ref[...] = contrib        # overwrite (acc held the attention context until now)

    @pl.when(f > 0)
    def _():
        acc_ref[...] += contrib

    # ---------------- residual + norm2 (last ff tile) ----------------------------------
    @pl.when(f == n_ff - 1)
    def _():
        ln = ln_ref[...]
        g2, b2 = ln[2:3, :], ln[3:4, :]
        y = h_ref[...] + acc_ref[...]
        mu = jnp.mean(y, axis=-1, keepdims=True)
        var = jnp.mean((y - mu) ** 2, axis=-1, keepdims=True)
        h_ref[...] = (y - mu) * jax.lax.rsqrt(var + 1e-5) * g2 + b2

    # Only the very last (layer, ff-tile) step of each batch chunk writes the HBM output.
    @pl.when((l == n_layers - 1) & (f == n_ff - 1))
    def _():
        out_ref[...] = h_ref[...].reshape(Bc, S, D).astype(out_ref.dtype)


def transformer_stack(x, p):
    """All layers in one pallas_call; weight blocks are streamed/prefetched over (l, f)."""
    B, S, D = x.shape
    L = p["wqkv"].shape[0]
    d_ff = p["ff1"].shape[2]

    # Batch-chunk axis ("parallel" -> megacore on v7x); layer / d_ff axes are sequential.
    Bc = B // 2 if B % 2 == 0 else B
    # d_ff weight tile: keep each double-buffered bf16 block small for v7x's 64 MiB VMEM.
    fft = 512 if d_ff % 512 == 0 else (128 if d_ff % 128 == 0 else d_ff)

    grid = (B // Bc, L, d_ff // fft)

    return pl.pallas_call(
        transformer_stack_kernel,
        out_shape=jax.ShapeDtypeStruct((B, S, D), jnp.bfloat16),
        grid=grid,
        in_specs=[
            pl.BlockSpec((Bc, S, D), lambda b, l, f: (b, 0, 0)),                 # tokens
            pl.BlockSpec((pl.Squeezed(), D, 3 * D), lambda b, l, f: (l, 0, 0)),  # fused QKV
            pl.BlockSpec((pl.Squeezed(), D, D), lambda b, l, f: (l, 0, 0)),      # wo
            pl.BlockSpec((pl.Squeezed(), D, fft), lambda b, l, f: (l, 0, f)),    # ff1 tile
            pl.BlockSpec((pl.Squeezed(), fft, D), lambda b, l, f: (l, f, 0)),    # ff2 tile
            pl.BlockSpec((pl.Squeezed(), 4, D), lambda b, l, f: (l, 0, 0)),      # [g1,b1,g2,b2]
        ],
        out_specs=pl.BlockSpec((Bc, S, D), lambda b, l, f: (b, 0, 0)),
        scratch_shapes=[pltpu.VMEM((Bc * S, D), jnp.float32),    # resident activations
                        pltpu.VMEM((Bc * S, D), jnp.float32)],   # ctx / FF accumulator
        compiler_params=pltpu.CompilerParams(
            dimension_semantics=("parallel", "arbitrary", "arbitrary"),
            vmem_limit_bytes=_vmem_limit_bytes(),
        ),
    )(x, p["wqkv"], p["wo"], p["ff1"], p["ff2"], p["ln"])


# ------------------------- LM head -------------------------

def lm_head_kernel(x_ref, w_ref, out_ref):
    out_ref[...] = jnp.dot(x_ref[...], w_ref[...],
                           preferred_element_type=jnp.float32).astype(out_ref.dtype)


def lm_head(x, w):
    """Tiled (tokens x vocab) matmul: bf16 inputs, f32 logits, large token tiles."""
    B, S, D = x.shape
    V = w.shape[1]
    M = B * S
    tm = 512 if M % 512 == 0 else (128 if M % 128 == 0 else M)
    tn = 1024 if V % 1024 == 0 else (128 if V % 128 == 0 else V)
    x2 = x.reshape(M, D)

    out = pl.pallas_call(
        lm_head_kernel,
        out_shape=jax.ShapeDtypeStruct((M, V), jnp.float32),
        grid=(M // tm, V // tn),
        in_specs=[pl.BlockSpec((tm, D), lambda i, j: (i, 0)),
                  pl.BlockSpec((D, tn), lambda i, j: (0, j))],
        out_specs=pl.BlockSpec((tm, tn), lambda i, j: (i, j)),
        compiler_params=pltpu.CompilerParams(
            dimension_semantics=("parallel", "parallel"),
            vmem_limit_bytes=_vmem_limit_bytes()),
    )(x2, w)
    return out.reshape(B, S, V)


# ------------------------- Full forward -------------------------

@jax.jit
def large_transformer_forward(input_ids, emb_table, stacked_params, head_w):
    # Embedding row gather — plain JAX glue (HBM-bound gather; no dense-kernel win).
    x = jnp.take(emb_table, input_ids, axis=0).astype(jnp.bfloat16)   # (B, S, D)
    x = transformer_stack(x, stacked_params)                          # all layers, one kernel
    return lm_head(x, head_w)                                         # (B, S, V) f32 logits


# ------------------------- Parameter init (deterministic) -------------------------

def init_params(key, d_model, d_ff, vocab_size, num_layers):
    keys = jax.random.split(key, 2 + num_layers)
    emb = jax.random.normal(keys[0], (vocab_size, d_model), jnp.float32)  # nn.Embedding ~N(0,1)

    def linear(k, fan_in, fan_out):
        bound = 1.0 / (fan_in ** 0.5)
        return jax.random.uniform(k, (fan_in, fan_out), jnp.float32, -bound, bound)

    scale = float(d_model) ** -0.5       # attention 1/sqrt(D) folded into the Q projection
    wqkv_l, wo_l, ff1_l, ff2_l, ln_l = [], [], [], [], []
    for i in range(num_layers):
        ks = jax.random.split(keys[1 + i], 6)
        wq = linear(ks[0], d_model, d_model) * scale
        wk = linear(ks[1], d_model, d_model)
        wv = linear(ks[2], d_model, d_model)
        wqkv_l.append(jnp.concatenate([wq, wk, wv], axis=1))           # (D, 3D) fused
        wo_l.append(linear(ks[3], d_model, d_model))
        ff1_l.append(linear(ks[4], d_model, d_ff))
        ff2_l.append(linear(ks[5], d_ff, d_model))
        ln_l.append(jnp.stack([jnp.ones((d_model,), jnp.float32),      # g1
                               jnp.zeros((d_model,), jnp.float32),     # b1
                               jnp.ones((d_model,), jnp.float32),      # g2
                               jnp.zeros((d_model,), jnp.float32)]))   # b2

    bf16 = jnp.bfloat16
    stacked = dict(
        wqkv=jnp.stack(wqkv_l).astype(bf16),   # (L, D, 3D) bf16
        wo=jnp.stack(wo_l).astype(bf16),       # (L, D, D)  bf16
        ff1=jnp.stack(ff1_l).astype(bf16),     # (L, D, d_ff) bf16
        ff2=jnp.stack(ff2_l).astype(bf16),     # (L, d_ff, D) bf16
        ln=jnp.stack(ln_l),                    # (L, 4, D)  f32
    )
    head = linear(keys[1 + num_layers], d_model, vocab_size).astype(bf16)  # (D, V) bf16
    return emb, stacked, head


# ------------------------- Main -------------------------

if __name__ == "__main__":
    B, S = 2, 8
    D_MODEL, D_FF, VOCAB, N_LAYERS = 128, 256, 256, 2

    key = jax.random.PRNGKey(0)
    k_param, k_ids = jax.random.split(key)
    emb, stacked_params, head_w = init_params(k_param, D_MODEL, D_FF, VOCAB, N_LAYERS)
    input_ids = jax.random.randint(k_ids, (B, S), 0, VOCAB, dtype=jnp.int32)

    logits = large_transformer_forward(input_ids, emb, stacked_params, head_w)
    jax.block_until_ready(logits)
    assert logits.shape == (B, S, VOCAB), logits.shape
    print("KERNEL_OK")
</pallas_src>

<mosaic_0001>
module attributes {stable_mosaic.version = 11 : i64} {
  func.func @lm_head_kernel(%arg0: i32, %arg1: i32, %arg2: memref<16x128xbf16, #tpu.memory_space<vmem>>, %arg3: memref<128x128xbf16, #tpu.memory_space<vmem>>, %arg4: memref<16x128xf32, #tpu.memory_space<vmem>>) attributes {dimension_semantics = [#tpu.dimension_semantics<parallel>, #tpu.dimension_semantics<parallel>], iteration_bounds = array<i64: 1, 2>, scalar_prefetch = 0 : i64, scratch_operands = 0 : i64, tpu.core_type = #tpu.core_type<tc>, window_params = [{transform_indices = @transform_0, window_bounds = array<i64: 16, 128>}, {transform_indices = @transform_1, window_bounds = array<i64: 128, 128>}, {transform_indices = @transform_2, window_bounds = array<i64: 16, 128>}]} {
    %c0 = arith.constant 0 : index
    %c0_0 = arith.constant 0 : index
    %0 = vector.load %arg2[%c0, %c0_0] : memref<16x128xbf16, #tpu.memory_space<vmem>>, vector<16x128xbf16>
    %c0_1 = arith.constant 0 : index
    %c0_2 = arith.constant 0 : index
    %1 = vector.load %arg3[%c0_1, %c0_2] : memref<128x128xbf16, #tpu.memory_space<vmem>>, vector<128x128xbf16>
    %cst = arith.constant dense<0.000000e+00> : vector<16x128xf32>
    %2 = tpu.matmul %0, %1, %cst {dimension_numbers = #tpu.dot_dimension_numbers<[1], [0], [0], [1], [0, 0, 1, 1], [], []>} : vector<16x128xbf16>, vector<128x128xbf16>, vector<16x128xf32> -> vector<16x128xf32>
    %c0_3 = arith.constant 0 : index
    %c0_4 = arith.constant 0 : index
    %3 = vector.load %arg4[%c0_3, %c0_4] : memref<16x128xf32, #tpu.memory_space<vmem>>, vector<16x128xf32>
    tpu.vector_store %arg4[%c0_3, %c0_4], %2 {strides = array<i32>} : memref<16x128xf32, #tpu.memory_space<vmem>>, vector<16x128xf32>,
    return
  }
  func.func @transform_0(%arg0: i32, %arg1: i32) -> (i32, i32) {
    %c0_i32 = arith.constant 0 : i32
    %c0_i32_0 = arith.constant 0 : i32
    return %arg0, %c0_i32 : i32, i32
  }
  func.func @transform_1(%arg0: i32, %arg1: i32) -> (i32, i32) {
    %c0_i32 = arith.constant 0 : i32
    %c0_i32_0 = arith.constant 0 : i32
    return %c0_i32, %arg1 : i32, i32
  }
  func.func @transform_2(%arg0: i32, %arg1: i32) -> (i32, i32) {
    %c0_i32 = arith.constant 0 : i32
    return %arg0, %arg1 : i32, i32
  }
}

module attributes {stable_mosaic.version = 11 : i64} {
  func.func @transformer_stack_kernel(%arg0: i32, %arg1: i32, %arg2: i32, %arg3: memref<1x8x128xbf16, #tpu.memory_space<vmem>>, %arg4: memref<1x128x384xbf16, #tpu.memory_space<vmem>>, %arg5: memref<1x128x128xbf16, #tpu.memory_space<vmem>>, %arg6: memref<1x128x128xbf16, #tpu.memory_space<vmem>>, %arg7: memref<1x128x128xbf16, #tpu.memory_space<vmem>>, %arg8: memref<1x4x128xf32, #tpu.memory_space<vmem>>, %arg9: memref<1x8x128xbf16, #tpu.memory_space<vmem>>, %arg10: memref<8x128xf32, #tpu.memory_space<vmem>>, %arg11: memref<8x128xf32, #tpu.memory_space<vmem>>) attributes {dimension_semantics = [#tpu.dimension_semantics<parallel>, #tpu.dimension_semantics<arbitrary>, #tpu.dimension_semantics<arbitrary>], iteration_bounds = array<i64: 2, 2, 2>, scalar_prefetch = 0 : i64, scratch_operands = 2 : i64, tpu.core_type = #tpu.core_type<tc>, window_params = [{transform_indices = @transform_0, window_bounds = array<i64: 1, 8, 128>}, {transform_indices = @transform_1, window_bounds = array<i64: 1, 128, 384>}, {transform_indices = @transform_2, window_bounds = array<i64: 1, 128, 128>}, {transform_indices = @transform_3, window_bounds = array<i64: 1, 128, 128>}, {transform_indices = @transform_4, window_bounds = array<i64: 1, 128, 128>}, {transform_indices = @transform_5, window_bounds = array<i64: 1, 4, 128>}, {transform_indices = @transform_6, window_bounds = array<i64: 1, 8, 128>}]} {
    %c0_i32 = arith.constant 0 : i32
    %0 = arith.cmpi eq, %arg1, %c0_i32 : i32
    %c0_i32_0 = arith.constant 0 : i32
    %1 = arith.cmpi eq, %arg2, %c0_i32_0 : i32
    %2 = arith.andi %0, %1 : i1
    %3 = arith.extui %2 : i1 to i32
    %c0_i32_1 = arith.constant 0 : i32
    %4 = arith.cmpi ne, %3, %c0_i32_1 : i32
    scf.if %4 {
      %c0_21 = arith.constant 0 : index
      %c0_22 = arith.constant 0 : index
      %c0_23 = arith.constant 0 : index
      %33 = vector.load %arg3[%c0_21, %c0_22, %c0_23] : memref<1x8x128xbf16, #tpu.memory_space<vmem>>, vector<1x8x128xbf16>
      %34 = vector.shape_cast %33 : vector<1x8x128xbf16> to vector<8x128xbf16>
      %35 = arith.extf %34 : vector<8x128xbf16> to vector<8x128xf32>
      %c0_24 = arith.constant 0 : index
      %c0_25 = arith.constant 0 : index
      %36 = vector.load %arg10[%c0_24, %c0_25] : memref<8x128xf32, #tpu.memory_space<vmem>>, vector<8x128xf32>
      tpu.vector_store %arg10[%c0_24, %c0_25], %35 {strides = array<i32>} : memref<8x128xf32, #tpu.memory_space<vmem>>, vector<8x128xf32>,
    } else {
    }
    %c0_i32_2 = arith.constant 0 : i32
    %5 = arith.cmpi eq, %arg2, %c0_i32_2 : i32
    %6 = arith.extui %5 : i1 to i32
    %c0_i32_3 = arith.constant 0 : i32
    %7 = arith.cmpi ne, %6, %c0_i32_3 : i32
    scf.if %7 {
      %c0_21 = arith.constant 0 : index
      %c0_22 = arith.constant 0 : index
      %33 = vector.load %arg10[%c0_21, %c0_22] : memref<8x128xf32, #tpu.memory_space<vmem>>, vector<8x128xf32>
      %34 = arith.truncf %33 : vector<8x128xf32> to vector<8x128xbf16>
      %c0_23 = arith.constant 0 : index
      %c0_24 = arith.constant 0 : index
      %c0_25 = arith.constant 0 : index
      %35 = vector.load %arg4[%c0_23, %c0_24, %c0_25] : memref<1x128x384xbf16, #tpu.memory_space<vmem>>, vector<1x128x384xbf16>
      %36 = vector.shape_cast %35 : vector<1x128x384xbf16> to vector<128x384xbf16>
      %cst_26 = arith.constant dense<0.000000e+00> : vector<8x384xf32>
      %37 = tpu.matmul %34, %36, %cst_26 {dimension_numbers = #tpu.dot_dimension_numbers<[1], [0], [0], [1], [0, 0, 1, 1], [], []>} : vector<8x128xbf16>, vector<128x384xbf16>, vector<8x384xf32> -> vector<8x384xf32>
      %38 = vector.extract_strided_slice %37 {offsets = [0, 128], sizes = [8, 128], strides = [1, 1]} : vector<8x384xf32> to vector<8x128xf32>
      %39 = arith.truncf %38 : vector<8x128xf32> to vector<8x128xbf16>
      %40 = vector.extract_strided_slice %37 {offsets = [0, 256], sizes = [8, 128], strides = [1, 1]} : vector<8x384xf32> to vector<8x128xf32>
      %41 = arith.truncf %40 : vector<8x128xf32> to vector<8x128xbf16>
      %42 = vector.extract_strided_slice %37 {offsets = [0, 0], sizes = [8, 128], strides = [1, 1]} : vector<8x384xf32> to vector<8x128xf32>
      %43 = arith.truncf %42 : vector<8x128xf32> to vector<8x128xbf16>
      %cst_27 = arith.constant dense<0.000000e+00> : vector<8x8xf32>
      %44 = tpu.matmul %43, %39, %cst_27 {dimension_numbers = #tpu.dot_dimension_numbers<[1], [1], [0], [0], [0, 0, 1, 0], [], []>} : vector<8x128xbf16>, vector<8x128xbf16>, vector<8x8xf32> -> vector<8x8xf32>
      %cst_28 = arith.constant dense<0xFF800000> : vector<8xf32>
      %45 = vector.multi_reduction <maximumf>, %44, %cst_28 [1] : vector<8x8xf32> to vector<8xf32>
      %46 = vector.shape_cast %45 : vector<8xf32> to vector<8x1xf32>
      %47 = vector.broadcast %46 : vector<8x1xf32> to vector<8x8xf32>
      %48 = arith.subf %44, %47 : vector<8x8xf32>
      %49 = math.exp %48 : vector<8x8xf32>
      %cst_29 = arith.constant dense<0.000000e+00> : vector<8xf32>
      %50 = vector.multi_reduction <add>, %49, %cst_29 [1] : vector<8x8xf32> to vector<8xf32>
      %51 = vector.shape_cast %50 : vector<8xf32> to vector<8x1xf32>
      %52 = tpu.reciprocal %51 {approx = true} : vector<8x1xf32> -> vector<8x1xf32>
      %53 = vector.broadcast %52 : vector<8x1xf32> to vector<8x8xf32>
      %54 = arith.mulf %49, %53 : vector<8x8xf32>
      %55 = arith.truncf %54 : vector<8x8xf32> to vector<8x8xbf16>
      %cst_30 = arith.constant dense<0.000000e+00> : vector<8x128xf32>
      %56 = tpu.matmul %55, %41, %cst_30 {dimension_numbers = #tpu.dot_dimension_numbers<[1], [0], [0], [1], [0, 0, 1, 1], [], []>} : vector<8x8xbf16>, vector<8x128xbf16>, vector<8x128xf32> -> vector<8x128xf32>
      %c0_31 = arith.constant 0 : index
      %c0_32 = arith.constant 0 : index
      %57 = vector.load %arg11[%c0_31, %c0_32] : memref<8x128xf32, #tpu.memory_space<vmem>>, vector<8x128xf32>
      tpu.vector_store %arg11[%c0_31, %c0_32], %56 {strides = array<i32>} : memref<8x128xf32, #tpu.memory_space<vmem>>, vector<8x128xf32>,
      %c0_33 = arith.constant 0 : index
      %c0_34 = arith.constant 0 : index
      %58 = vector.load %arg11[%c0_33, %c0_34] : memref<8x128xf32, #tpu.memory_space<vmem>>, vector<8x128xf32>
      %59 = arith.truncf %58 : vector<8x128xf32> to vector<8x128xbf16>
      %c0_35 = arith.constant 0 : index
      %c0_36 = arith.constant 0 : index
      %c0_37 = arith.constant 0 : index
      %60 = vector.load %arg5[%c0_35, %c0_36, %c0_37] : memref<1x128x128xbf16, #tpu.memory_space<vmem>>, vector<1x128x128xbf16>
      %61 = vector.shape_cast %60 : vector<1x128x128xbf16> to vector<128x128xbf16>
      %cst_38 = arith.constant dense<0.000000e+00> : vector<8x128xf32>
      %62 = tpu.matmul %59, %61, %cst_38 {dimension_numbers = #tpu.dot_dimension_numbers<[1], [0], [0], [1], [0, 0, 1, 1], [], []>} : vector<8x128xbf16>, vector<128x128xbf16>, vector<8x128xf32> -> vector<8x128xf32>
      %c0_39 = arith.constant 0 : index
      %c0_40 = arith.constant 0 : index
      %c0_41 = arith.constant 0 : index
      %63 = vector.load %arg8[%c0_39, %c0_40, %c0_41] : memref<1x4x128xf32, #tpu.memory_space<vmem>>, vector<1x4x128xf32>
      %64 = vector.shape_cast %63 : vector<1x4x128xf32> to vector<4x128xf32>
      %65 = vector.extract_strided_slice %64 {offsets = [0, 0], sizes = [1, 128], strides = [1, 1]} : vector<4x128xf32> to vector<1x128xf32>
      %66 = vector.extract_strided_slice %64 {offsets = [1, 0], sizes = [1, 128], strides = [1, 1]} : vector<4x128xf32> to vector<1x128xf32>
      %67 = arith.addf %33, %62 : vector<8x128xf32>
      %cst_42 = arith.constant dense<0.000000e+00> : vector<8xf32>
      %68 = vector.multi_reduction <add>, %67, %cst_42 [1] : vector<8x128xf32> to vector<8xf32>
      %69 = vector.shape_cast %68 : vector<8xf32> to vector<8x1xf32>
      %cst_43 = arith.constant 1.280000e+02 : f32
      %70 = vector.broadcast %cst_43 : f32 to vector<8x1xf32>
      %71 = arith.divf %69, %70 : vector<8x1xf32>
      %72 = vector.broadcast %71 : vector<8x1xf32> to vector<8x128xf32>
      %73 = arith.subf %67, %72 : vector<8x128xf32>
      %74 = arith.mulf %73, %73 : vector<8x128xf32>
      %cst_44 = arith.constant dense<0.000000e+00> : vector<8xf32>
      %75 = vector.multi_reduction <add>, %74, %cst_44 [1] : vector<8x128xf32> to vector<8xf32>
      %76 = vector.shape_cast %75 : vector<8xf32> to vector<8x1xf32>
      %cst_45 = arith.constant 1.280000e+02 : f32
      %77 = vector.broadcast %cst_45 : f32 to vector<8x1xf32>
      %78 = arith.divf %76, %77 : vector<8x1xf32>
      %79 = vector.broadcast %71 : vector<8x1xf32> to vector<8x128xf32>
      %80 = arith.subf %67, %79 : vector<8x128xf32>
      %cst_46 = arith.constant 9.99999974E-6 : f32
      %81 = vector.broadcast %cst_46 : f32 to vector<8x1xf32>
      %82 = arith.addf %78, %81 : vector<8x1xf32>
      %83 = math.rsqrt %82 : vector<8x1xf32>
      %84 = vector.broadcast %83 : vector<8x1xf32> to vector<8x128xf32>
      %85 = arith.mulf %80, %84 : vector<8x128xf32>
      %86 = vector.broadcast %65 : vector<1x128xf32> to vector<8x128xf32>
      %87 = arith.mulf %85, %86 : vector<8x128xf32>
      %88 = vector.broadcast %66 : vector<1x128xf32> to vector<8x128xf32>
      %89 = arith.addf %87, %88 : vector<8x128xf32>
      %c0_47 = arith.constant 0 : index
      %c0_48 = arith.constant 0 : index
      %90 = vector.load %arg10[%c0_47, %c0_48] : memref<8x128xf32, #tpu.memory_space<vmem>>, vector<8x128xf32>
      tpu.vector_store %arg10[%c0_47, %c0_48], %89 {strides = array<i32>} : memref<8x128xf32, #tpu.memory_space<vmem>>, vector<8x128xf32>,
    } else {
    }
    %c0 = arith.constant 0 : index
    %c0_4 = arith.constant 0 : index
    %8 = vector.load %arg10[%c0, %c0_4] : memref<8x128xf32, #tpu.memory_space<vmem>>, vector<8x128xf32>
    %9 = arith.truncf %8 : vector<8x128xf32> to vector<8x128xbf16>
    %c0_5 = arith.constant 0 : index
    %c0_6 = arith.constant 0 : index
    %c0_7 = arith.constant 0 : index
    %10 = vector.load %arg6[%c0_5, %c0_6, %c0_7] : memref<1x128x128xbf16, #tpu.memory_space<vmem>>, vector<1x128x128xbf16>
    %11 = vector.shape_cast %10 : vector<1x128x128xbf16> to vector<128x128xbf16>
    %cst = arith.constant dense<0.000000e+00> : vector<8x128xf32>
    %12 = tpu.matmul %9, %11, %cst {dimension_numbers = #tpu.dot_dimension_numbers<[1], [0], [0], [1], [0, 0, 1, 1], [], []>} : vector<8x128xbf16>, vector<128x128xbf16>, vector<8x128xf32> -> vector<8x128xf32>
    %cst_8 = arith.constant 0.000000e+00 : f32
    %13 = vector.broadcast %cst_8 : f32 to vector<8x128xf32>
    %14 = arith.maximumf %12, %13 : vector<8x128xf32>
    %15 = arith.truncf %14 : vector<8x128xf32> to vector<8x128xbf16>
    %c0_9 = arith.constant 0 : index
    %c0_10 = arith.constant 0 : index
    %c0_11 = arith.constant 0 : index
    %16 = vector.load %arg7[%c0_9, %c0_10, %c0_11] : memref<1x128x128xbf16, #tpu.memory_space<vmem>>, vector<1x128x128xbf16>
    %17 = vector.shape_cast %16 : vector<1x128x128xbf16> to vector<128x128xbf16>
    %cst_12 = arith.constant dense<0.000000e+00> : vector<8x128xf32>
    %18 = tpu.matmul %15, %17, %cst_12 {dimension_numbers = #tpu.dot_dimension_numbers<[1], [0], [0], [1], [0, 0, 1, 1], [], []>} : vector<8x128xbf16>, vector<128x128xbf16>, vector<8x128xf32> -> vector<8x128xf32>
    %c0_i32_13 = arith.constant 0 : i32
    %19 = arith.cmpi eq, %arg2, %c0_i32_13 : i32
    %20 = arith.extui %19 : i1 to i32
    %c0_i32_14 = arith.constant 0 : i32
    %21 = arith.cmpi ne, %20, %c0_i32_14 : i32
    scf.if %21 {
      %c0_21 = arith.constant 0 : index
      %c0_22 = arith.constant 0 : index
      %33 = vector.load %arg11[%c0_21, %c0_22] : memref<8x128xf32, #tpu.memory_space<vmem>>, vector<8x128xf32>
      tpu.vector_store %arg11[%c0_21, %c0_22], %18 {strides = array<i32>} : memref<8x128xf32, #tpu.memory_space<vmem>>, vector<8x128xf32>,
    } else {
    }
    %c0_i32_15 = arith.constant 0 : i32
    %22 = arith.cmpi sgt, %arg2, %c0_i32_15 : i32
    %23 = arith.extui %22 : i1 to i32
    %c0_i32_16 = arith.constant 0 : i32
    %24 = arith.cmpi ne, %23, %c0_i32_16 : i32
    scf.if %24 {
      %c0_21 = arith.constant 0 : index
      %c0_22 = arith.constant 0 : index
      %33 = vector.load %arg11[%c0_21, %c0_22] : memref<8x128xf32, #tpu.memory_space<vmem>>, vector<8x128xf32>
      %34 = arith.addf %33, %18 : vector<8x128xf32>
      %c0_23 = arith.constant 0 : index
      %c0_24 = arith.constant 0 : index
      %35 = vector.load %arg11[%c0_23, %c0_24] : memref<8x128xf32, #tpu.memory_space<vmem>>, vector<8x128xf32>
      tpu.vector_store %arg11[%c0_23, %c0_24], %34 {strides = array<i32>} : memref<8x128xf32, #tpu.memory_space<vmem>>, vector<8x128xf32>,
    } else {
    }
    %c1_i32 = arith.constant 1 : i32
    %25 = arith.cmpi eq, %arg2, %c1_i32 : i32
    %26 = arith.extui %25 : i1 to i32
    %c0_i32_17 = arith.constant 0 : i32
    %27 = arith.cmpi ne, %26, %c0_i32_17 : i32
    scf.if %27 {
      %c0_21 = arith.constant 0 : index
      %c0_22 = arith.constant 0 : index
      %c0_23 = arith.constant 0 : index
      %33 = vector.load %arg8[%c0_21, %c0_22, %c0_23] : memref<1x4x128xf32, #tpu.memory_space<vmem>>, vector<1x4x128xf32>
      %34 = vector.shape_cast %33 : vector<1x4x128xf32> to vector<4x128xf32>
      %35 = vector.extract_strided_slice %34 {offsets = [2, 0], sizes = [1, 128], strides = [1, 1]} : vector<4x128xf32> to vector<1x128xf32>
      %36 = vector.extract_strided_slice %34 {offsets = [3, 0], sizes = [1, 128], strides = [1, 1]} : vector<4x128xf32> to vector<1x128xf32>
      %c0_24 = arith.constant 0 : index
      %c0_25 = arith.constant 0 : index
      %37 = vector.load %arg10[%c0_24, %c0_25] : memref<8x128xf32, #tpu.memory_space<vmem>>, vector<8x128xf32>
      %c0_26 = arith.constant 0 : index
      %c0_27 = arith.constant 0 : index
      %38 = vector.load %arg11[%c0_26, %c0_27] : memref<8x128xf32, #tpu.memory_space<vmem>>, vector<8x128xf32>
      %39 = arith.addf %37, %38 : vector<8x128xf32>
      %cst_28 = arith.constant dense<0.000000e+00> : vector<8xf32>
      %40 = vector.multi_reduction <add>, %39, %cst_28 [1] : vector<8x128xf32> to vector<8xf32>
      %41 = vector.shape_cast %40 : vector<8xf32> to vector<8x1xf32>
      %cst_29 = arith.constant 1.280000e+02 : f32
      %42 = vector.broadcast %cst_29 : f32 to vector<8x1xf32>
      %43 = arith.divf %41, %42 : vector<8x1xf32>
      %44 = vector.broadcast %43 : vector<8x1xf32> to vector<8x128xf32>
      %45 = arith.subf %39, %44 : vector<8x128xf32>
      %46 = arith.mulf %45, %45 : vector<8x128xf32>
      %cst_30 = arith.constant dense<0.000000e+00> : vector<8xf32>
      %47 = vector.multi_reduction <add>, %46, %cst_30 [1] : vector<8x128xf32> to vector<8xf32>
      %48 = vector.shape_cast %47 : vector<8xf32> to vector<8x1xf32>
      %cst_31 = arith.constant 1.280000e+02 : f32
      %49 = vector.broadcast %cst_31 : f32 to vector<8x1xf32>
      %50 = arith.divf %48, %49 : vector<8x1xf32>
      %51 = vector.broadcast %43 : vector<8x1xf32> to vector<8x128xf32>
      %52 = arith.subf %39, %51 : vector<8x128xf32>
      %cst_32 = arith.constant 9.99999974E-6 : f32
      %53 = vector.broadcast %cst_32 : f32 to vector<8x1xf32>
      %54 = arith.addf %50, %53 : vector<8x1xf32>
      %55 = math.rsqrt %54 : vector<8x1xf32>
      %56 = vector.broadcast %55 : vector<8x1xf32> to vector<8x128xf32>
      %57 = arith.mulf %52, %56 : vector<8x128xf32>
      %58 = vector.broadcast %35 : vector<1x128xf32> to vector<8x128xf32>
      %59 = arith.mulf %57, %58 : vector<8x128xf32>
      %60 = vector.broadcast %36 : vector<1x128xf32> to vector<8x128xf32>
      %61 = arith.addf %59, %60 : vector<8x128xf32>
      %c0_33 = arith.constant 0 : index
      %c0_34 = arith.constant 0 : index
      %62 = vector.load %arg10[%c0_33, %c0_34] : memref<8x128xf32, #tpu.memory_space<vmem>>, vector<8x128xf32>
      tpu.vector_store %arg10[%c0_33, %c0_34], %61 {strides = array<i32>} : memref<8x128xf32, #tpu.memory_space<vmem>>, vector<8x128xf32>,
    } else {
    }
    %c1_i32_18 = arith.constant 1 : i32
    %28 = arith.cmpi eq, %arg1, %c1_i32_18 : i32
    %c1_i32_19 = arith.constant 1 : i32
    %29 = arith.cmpi eq, %arg2, %c1_i32_19 : i32
    %30 = arith.andi %28, %29 : i1
    %31 = arith.extui %30 : i1 to i32
    %c0_i32_20 = arith.constant 0 : i32
    %32 = arith.cmpi ne, %31, %c0_i32_20 : i32
    scf.if %32 {
      %c0_21 = arith.constant 0 : index
      %c0_22 = arith.constant 0 : index
      %33 = vector.load %arg10[%c0_21, %c0_22] : memref<8x128xf32, #tpu.memory_space<vmem>>, vector<8x128xf32>
      %34 = vector.shape_cast %33 : vector<8x128xf32> to vector<1x8x128xf32>
      %35 = arith.truncf %34 : vector<1x8x128xf32> to vector<1x8x128xbf16>
      %c0_23 = arith.constant 0 : index
      %c0_24 = arith.constant 0 : index
      %c0_25 = arith.constant 0 : index
      %36 = vector.load %arg9[%c0_23, %c0_24, %c0_25] : memref<1x8x128xbf16, #tpu.memory_space<vmem>>, vector<1x8x128xbf16>
      tpu.vector_store %arg9[%c0_23, %c0_24, %c0_25], %35 {strides = array<i32>} : memref<1x8x128xbf16, #tpu.memory_space<vmem>>, vector<1x8x128xbf16>,
    } else {
    }
    return
  }
  func.func @transform_0(%arg0: i32, %arg1: i32, %arg2: i32) -> (i32, i32, i32) {
    %c0_i32 = arith.constant 0 : i32
    %c0_i32_0 = arith.constant 0 : i32
    %c0_i32_1 = arith.constant 0 : i32
    return %arg0, %c0_i32, %c0_i32_0 : i32, i32, i32
  }
  func.func @transform_1(%arg0: i32, %arg1: i32, %arg2: i32) -> (i32, i32, i32) {
    %c0_i32 = arith.constant 0 : i32
    %c0_i32_0 = arith.constant 0 : i32
    %c0_i32_1 = arith.constant 0 : i32
    return %arg1, %c0_i32, %c0_i32_0 : i32, i32, i32
  }
  func.func @transform_2(%arg0: i32, %arg1: i32, %arg2: i32) -> (i32, i32, i32) {
    %c0_i32 = arith.constant 0 : i32
    %c0_i32_0 = arith.constant 0 : i32
    %c0_i32_1 = arith.constant 0 : i32
    return %arg1, %c0_i32, %c0_i32_0 : i32, i32, i32
  }
  func.func @transform_3(%arg0: i32, %arg1: i32, %arg2: i32) -> (i32, i32, i32) {
    %c0_i32 = arith.constant 0 : i32
    %c0_i32_0 = arith.constant 0 : i32
    return %arg1, %c0_i32, %arg2 : i32, i32, i32
  }
  func.func @transform_4(%arg0: i32, %arg1: i32, %arg2: i32) -> (i32, i32, i32) {
    %c0_i32 = arith.constant 0 : i32
    %c0_i32_0 = arith.constant 0 : i32
    return %arg1, %arg2, %c0_i32 : i32, i32, i32
  }
  func.func @transform_5(%arg0: i32, %arg1: i32, %arg2: i32) -> (i32, i32, i32) {
    %c0_i32 = arith.constant 0 : i32
    %c0_i32_0 = arith.constant 0 : i32
    %c0_i32_1 = arith.constant 0 : i32
    return %arg1, %c0_i32, %c0_i32_0 : i32, i32, i32
  }
  func.func @transform_6(%arg0: i32, %arg1: i32, %arg2: i32) -> (i32, i32, i32) {
    %c0_i32 = arith.constant 0 : i32
    %c0_i32_0 = arith.constant 0 : i32
    %c0_i32_1 = arith.constant 0 : i32
    return %arg0, %c0_i32, %c0_i32_0 : i32, i32, i32
  }
}

</mosaic_0001>

<bundles_post_ra>
// kernel: large_transformer_forward.3
= control target key start
LH: loop header
LB: loop body
LE: loop exit
PB: predicated region body
PF: predicated region fallthrough
CT: control target
= control target key end

     0   :  { %7 = vsyncpa [#allocation4], 0  ;;  %s871_s0 = inlined_call_operand.vmem [shape: bf16[16,128], index: 0, kind: input, shape index: {}]   ;;  %s872_s1 = inlined_call_operand.vmem [shape: bf16[128,256], index: 1, kind: input, shape index: {}]   ;;  %s873_s2 = inlined_call_operand.hbm [shape: f32[16,256], index: 2, kind: output, shape index: {}]  }
   0x1   :  { %9 = vsyncpa [#allocation4 + $0x1], 0  ;;  %s727_s9 = smov 0   ;;  %s729_s10 = smov 0  }
   0x2   :  { %s731_s11 = smov 0   ;;  %s733_s12 = smov 0  }
   0x3   :  { %s735_s13 = smov 0   ;;  %s737_s14 = smov 0  }
   0x4 LB: > { %s507_s15 = sadd.s32 4294967295, %s704_s14   ;;  %s508_s16 = sadd.s32 4294967294, %s704_s14   ;;  %s704_s14 = sphi %s737_s14, %s15_s14   ;;  %s700_s13 = sphi %s735_s13, %s880_s13   ;;  %s696_s12 = sphi %s733_s12, %s879_s12   ;;  %s692_s11 = sphi %s731_s11, %s878_s11   ;;  %s688_s10 = sphi %s729_s10, %s877_s10   ;;  %s684_s9 = sphi %s727_s9, %s876_s9  }
   0x5   : > { %s24_s17 = sadd.s32 1, %s700_s13  ;;  %s60_s18 = sadd.s32 1, %s692_s11 }
   0x6   : > { %p25_p0 = scmp.ge.s32.totalorder %s24_s17, 2  ;;  %p67_p1 = scmp.ne.s32.totalorder %s692_s11, %s688_s10 }
   0x7   : > { %p68_p2 = scmp.eq.s32.totalorder %s704_s14, 0  ;;  %p99_p3 = scmp.eq.s32.totalorder %s507_s15, 1 }
   0x8   : > { %s882_s17 = smov (%p25_p0, %s24_s17), 0  ;;  %p104_p6 = scmp.ne.s32.totalorder %s688_s10, %s684_s9 }
   0x9   : > { %p69_p4 = por %p68_p2, %p67_p1  ;;  %p766_p5 = por %p99_p3, %p67_p1 }
   0xa   : > { %s57_s20 = ssub.s32 %s700_s13, %s882_s17  ;;  %p105_p8 = scmp.eq.s32.totalorder %s508_s16, 1 }
   0xb   : > { %p58_p7 = scmp.eq.s32.totalorder %s57_s20, 0  ;;  %p511_p10 = scmp.ge.s32.totalorder %s704_s14, 2 }
   0xc   : > { %p777_p9 = por %p105_p8, %p104_p6 }
   0xd   : > { %s775_s21 = scalar_select %p58_p7, %s692_s11, %s60_s18  }
   0xe   : > { %130 = sbr.rel (%p511_p10) target bundleno = 33 (0x21), region = 20 }
  0x13   : > { %133 = sbr.rel (!%p69_p4) target bundleno = 33 (0x21), region = 24  ;;  %s135_s23 = sand.u32 (%p69_p4), 1, %s692_s11  }
  0x14   : > { %s513_s24 = sshll.u32 (%p69_p4), %s700_s13, 2  ;;  %s512_s25 = sshll.u32 (%p69_p4), %s135_s23, 6 }
  0x15   : > { %s789_s28 = scalar_lea.vmem (%p69_p4), %s872_s1, %s513_s24  ;;  %s137_s29 = scalar_lea.vmem (%p69_p4), [#allocation2], %s512_s25 }
  0x16   : > { %v156_v0 = vld [vmem:[%s789_s28] sm:$0xf] (%p69_p4)  ;;  %v158_v1 = vld [vmem:[%s789_s28 + $0x8] sm:$0xf] (%p69_p4)  ;;  %v160_v2 = vld [vmem:[%s789_s28 + $0x10] sm:$0xf] (%p69_p4) }
  0x17   : > { %157 = vst [vmem:[%s137_s29] sm:$0xf] (%p69_p4), %v156_v0  ;;  %159 = vst [vmem:[%s137_s29 + $0x4] sm:$0xf] (%p69_p4), %v158_v1  ;;  %v162_v3 = vld [vmem:[%s789_s28 + $0x18] sm:$0xf] (%p69_p4) }
  0x18   : > { %v164_v4 = vld [vmem:[%s789_s28 + $0x20] sm:$0xf]  ;;  %161 = vst [vmem:[%s137_s29 + $0x8] sm:$0xf] %v160_v2  ;;  %163 = vst [vmem:[%s137_s29 + $0xc] sm:$0xf] %v162_v3 }
  0x19   : > { %165 = vst [vmem:[%s137_s29 + $0x10] sm:$0xf] %v164_v4  ;;  %v166_v5 = vld [vmem:[%s789_s28 + $0x28] sm:$0xf]  ;;  %v168_v6 = vld [vmem:[%s789_s28 + $0x30] sm:$0xf] }
  0x1a   : > { %v170_v7 = vld [vmem:[%s789_s28 + $0x38] sm:$0xf]  ;;  %167 = vst [vmem:[%s137_s29 + $0x14] sm:$0xf] %v166_v5  ;;  %169 = vst [vmem:[%s137_s29 + $0x18] sm:$0xf] %v168_v6 }
  0x1b   : > { %171 = vst [vmem:[%s137_s29 + $0x1c] sm:$0xf] %v170_v7  ;;  %v172_v8 = vld [vmem:[%s789_s28 + $0x40] sm:$0xf]  ;;  %v174_v9 = vld [vmem:[%s789_s28 + $0x48] sm:$0xf] }
  0x1c   : > { %v176_v10 = vld [vmem:[%s789_s28 + $0x50] sm:$0xf]  ;;  %173 = vst [vmem:[%s137_s29 + $0x20] sm:$0xf] %v172_v8  ;;  %175 = vst [vmem:[%s137_s29 + $0x24] sm:$0xf] %v174_v9 }
  0x1d   : > { %177 = vst [vmem:[%s137_s29 + $0x28] sm:$0xf] %v176_v10  ;;  %v178_v11 = vld [vmem:[%s789_s28 + $0x58] sm:$0xf]  ;;  %v180_v12 = vld [vmem:[%s789_s28 + $0x60] sm:$0xf] }
  0x1e   : > { %v182_v13 = vld [vmem:[%s789_s28 + $0x68] sm:$0xf]  ;;  %179 = vst [vmem:[%s137_s29 + $0x2c] sm:$0xf] %v178_v11  ;;  %181 = vst [vmem:[%s137_s29 + $0x30] sm:$0xf] %v180_v12 }
  0x1f   : > { %183 = vst [vmem:[%s137_s29 + $0x34] sm:$0xf] %v182_v13  ;;  %v184_v14 = vld [vmem:[%s789_s28 + $0x70] sm:$0xf]  ;;  %v186_v15 = vld [vmem:[%s789_s28 + $0x78] sm:$0xf] }
  0x20   : > { %185 = vst [vmem:[%s137_s29 + $0x38] sm:$0xf] %v184_v14  ;;  %187 = vst [vmem:[%s137_s29 + $0x3c] sm:$0xf] %v186_v15 }
  0x21 PF: > { %p514_p11 = scmp.ge.s32.totalorder %s704_s14, 1  ;;  %p242_p12 = scmp.lt.s32.totalorder %s704_s14, 3 }
  0x23   : > { %p243_p13 = pnand %p514_p11, %p242_p12 }
  0x24   : > { %s810_s30 = sand.u32 (!%p243_p13), 1, %s688_s10   ;;  %s527_s16 = sshll.u32 (!%p243_p13), %s696_s12, 7 }
  0x25   : > { %246 = sbr.rel (%p243_p13) target bundleno = 288 (0x120), region = 65  ;;  %s515_s3 = sshll.u32 (!%p243_p13), %s810_s30, 6 }
  0x26   : > { %s251_s4 = scalar_lea.vmem (!%p243_p13), [#allocation2], %s515_s3  ;;  %s516_s7 = sshll.u32 (!%p243_p13), %s810_s30, 4 }
  0x27   : > { %s274_s8 = scalar_lea.vmem (!%p243_p13), [#allocation3], %s516_s7  ;;  %s823_s23 = scalar_lea.hbm (!%p243_p13), %s873_s2, %s527_s16 }
  0x28   : > { %s414_s15 = sshll.u32 (!%p243_p13), %s274_s8, 4  ;;  %s399_s24 = scalar_lea.sflag (!%p243_p13), [#allocation4], %s810_s30  ;;  %s818_s15 = int_to_ptr.vmem [resolvable:$true] %s414_s15 }
  0x29   : > { %s628_s25 = scalar_lea.vmem (!%p243_p13), %s818_s15, 256  ;;  %s708_s12 = smov (!%p243_p13), [#allocation3]  }
  0x2a   : > { %v706_v16 = vmov 0.0   ;;  %vm707_vm0 = vmmov 0   ;;  %v619_v17 = vld [vmem:[%s251_s4 + $0x38] sm:$0xff]   ;;  %v620_v18 = vld [vmem:[%s251_s4 + $0x30] sm:$0xff]   ;;  %v621_v19 = vld [vmem:[%s251_s4 + $0x28] sm:$0xff]   ;;  %p629_p0 = scmp.ne.s32.totalorder %s818_s15, %s628_s25  ;;  %s632_s26 = sshll.u32 %s708_s12, 4  ;;  %s633_s26 = int_to_ptr.vmem [resolvable:$false] %s632_s26 }
  0x2b   : > { %539 = vmatprep.subr.bf16.mxu0 %v706_v16  ;;  %555 = vmatprep.mubr.msk.bf16.mxu0 %vm707_vm0, %v706_v16  ;;  %v622_v20 = vld [vmem:[%s251_s4 + $0x20] sm:$0xff]   ;;  %v623_v21 = vld [vmem:[%s251_s4 + $0x18] sm:$0xff]   ;;  %v624_v22 = vld [vmem:[%s251_s4 + $0x10] sm:$0xff]   ;;  %s634_s27 = scalar_lea.vmem %s633_s26, 512  ;;  %p635_p3 = scmp.lt.s32.totalorder %s818_s15, %s633_s26 }
  0x2c   : > { %540 = vmatpush3.bf16.msra.mxu0 %v619_v17  ;;  %v625_v23 = vld [vmem:[%s251_s4 + $0x8] sm:$0xff]   ;;  %v626_v24 = vld [vmem:[%s251_s4] sm:$0xff]   ;;  %p630_p1 = pnand %p629_p0, %p766_p5  ;;  %p636_p4 = scmp.lt.s32.totalorder %s634_s27, %s628_s25 }
  0x2d   : > { %541 = vmatprep.subr.bf16.mxu0 %v706_v16  ;;  %v627_v25 = vld [vmem:[%s871_s0] sm:$0xff]  }
  0x2e   : > { %p631_p2 = pneg %p630_p1  ;;  %p637_p6 = por %p636_p4, %p635_p3 }
  0x30   : > { %542 = vmatpush3.bf16.msra.mxu0 %v620_v18  ;;  %p638_p7 = pnand %p637_p6, %p631_p2 }
  0x31   : > { %543 = vmatprep.subr.bf16.mxu0 %v706_v16 }
  0x34   : > { %544 = vmatpush3.bf16.msra.mxu0 %v621_v19 }
  0x35   : > { %545 = vmatprep.subr.bf16.mxu0 %v706_v16 }
  0x38   : > { %546 = vmatpush3.bf16.msra.mxu0 %v622_v20 }
  0x39   : > { %547 = vmatprep.subr.bf16.mxu0 %v706_v16 }
  0x3c   : > { %548 = vmatpush3.bf16.msra.mxu0 %v623_v21 }
  0x3d   : > { %549 = vmatprep.subr.bf16.mxu0 %v706_v16 }
  0x40   : > { %550 = vmatpush3.bf16.msra.mxu0 %v624_v22 }
  0x41   : > { %551 = vmatprep.subr.bf16.mxu0 %v706_v16 }
  0x44   : > { %552 = vmatpush3.bf16.msra.mxu0 %v625_v23 }
  0x45   : > { %553 = vmatprep.subr.bf16.mxu0 %v706_v16 }
  0x48   : > { %554 = vmatpush3.bf16.msra.mxu0 %v626_v24 }
  0x4b   : > { %556 = vmatmul.mubr.bf16.vlgmr.msra.gmra.mxu0 %v627_v25 }
 0x10b   : > { %v389_v26 = vpop.f32.mrf.mxu0 }
 0x10c   : > { %396 = vst [vmem:[%s274_s8] sm:$0xff] %v389_v26 }
 0x10d   : > { %v557_v27 = vpop.f32.mrf.mxu0 }
 0x10f   : > { %v392_v28 = vpop.f32.mrf.mxu0 }
 0x110   : > { %397 = vst [vmem:[%s274_s8 + $0x8] sm:$0xff] %v392_v28 }
 0x111   : > { %v558_v29 = vpop.f32.mrf.mxu0 }
 0x112   : > { %641 = shalt.err (!%p638_p7)
}
 0x113   : > { %s642_s28 = scalar_lea.hbm %s823_s23, 256  ;;  %s646_s4 = scalar_lea.hbm %s873_s2, 512 }
 0x114   : > { %p643_p8 = scmp.ne.s32.totalorder %s823_s23, %s642_s28  ;;  %p647_p13 = scmp.lt.s32.totalorder %s823_s23, %s873_s2 }
 0x115   : > { %p648_p0 = scmp.lt.s32.totalorder %s646_s4, %s642_s28 }
 0x116   : > { %p644_p11 = pnand %p643_p8, %p766_p5 }
 0x117   : > { %p649_p1 = por %p648_p0, %p647_p13 }
 0x118   : > { %p645_p12 = pneg %p644_p11 }
 0x11a   : > { %p650_p2 = pnand %p649_p1, %p645_p12 }
 0x11c   : > { %653 = shalt.err (!%p650_p2)
}
 0x11d   : > { %s709_s7 = smov 128   ;;  %s710_s8 = smov 256  }
 0x11e   : > { %s711_s16 = smov 8  }
 0x11f   : > { %559 = dma.vmem_to_hbm [thread:$0]  (%p766_p5), %s818_s15, 256, %s823_s23, %s399_s24, %s709_s7, %s710_s8, %s711_s16  }
 0x120 PF: > { %s429_s18 = sand.u32 1, %s684_s9   ;;  %p562_p3 = pnand %p511_p10, %p777_p9 }
 0x121   : > { %s430_s20 = scalar_lea.sflag [#allocation4], %s429_s18 }
 0x122   : > { %p563_p4 = pneg %p562_p3 }
 0x124   : > { %679 = dma.done.wait (%p563_p4), %s430_s20, 256  }
 0x125   : > { %681 = vsyncadd (%p563_p4), %s430_s20, 4294967040  ;;  %s15_s14 = sadd.s32 1, %s704_s14   ;;  %s876_s9 = smov %s688_s10 }
 0x126   : > { %p12_p6 = scmp.ge.s32.totalorder %s15_s14, 4   ;;  %s877_s10 = smov %s692_s11 }
 0x127   : > { %s878_s11 = smov %s775_s21  ;;  %s879_s12 = smov %s700_s13 }
 0x128   : > { %s880_s13 = smov %s882_s17  ;;  %14 = sbr.rel (!%p12_p6) target bundleno = 4 (0x4), region = 112 }
 0x12d   :  { %435 = vsyncpa [#allocation4], 1 }
 0x12e   :  { %437 = vsyncpa [#allocation4 + $0x1], 1 }

// kernel: large_transformer_forward.2
= control target key start
LH: loop header
LB: loop body
LE: loop exit
PB: predicated region body
PF: predicated region fallthrough
CT: control target
= control target key end

     0   :  { %s2471_s0 = inlined_call_operand.vmem [shape: bf16[2,8,128], index: 0, kind: input, shape index: {}]   ;;  %s2472_s1 = inlined_call_operand.hbm [shape: bf16[2,128,384], index: 1, kind: input, shape index: {}]   ;;  %s2473_s2 = inlined_call_operand.hbm [shape: bf16[2,128,128], index: 2, kind: input, shape index: {}]   ;;  %s2474_s3 = inlined_call_operand.hbm [shape: bf16[2,128,256], index: 3, kind: input, shape index: {}]   ;;  %s2475_s4 = inlined_call_operand.hbm [shape: bf16[2,256,128], index: 4, kind: input, shape index: {}]   ;;  %s2476_s5 = inlined_call_operand.vmem [shape: f32[2,4,128], index: 5, kind: input, shape index: {}]   ;;  %s2477_s6 = inlined_call_operand.vmem [shape: bf16[2,8,128], index: 6, kind: output, shape index: {}]  }
   0x1   :  { %2491 = sst [smem:[#allocation25_spill]] %s2471_s0 }
   0x2   :  { %2492 = sst [smem:[#allocation26_spill]] %s2472_s1 }
   0x3   :  { %2493 = sst [smem:[#allocation27_spill]] %s2473_s2 }
   0x4   :  { %2494 = sst [smem:[#allocation28_spill]] %s2474_s3 }
   0x5   :  { %2495 = sst [smem:[#allocation29_spill]] %s2476_s5 }
   0x6   :  { %2496 = sst [smem:[#allocation30_spill]] %s2477_s6 }
   0x7   :  { %11 = vsyncpa [#allocation5], 0 }
   0x8   :  { %13 = vsyncpa [#allocation5 + $0x1], 0 }
   0x9   :  { %14 = vsyncpa [#allocation7], 0 }
   0xa   :  { %16 = vsyncpa [#allocation7 + $0x1], 0 }
   0xb   :  { %17 = vsyncpa [#allocation10], 0 }
   0xc   :  { %19 = vsyncpa [#allocation10 + $0x1], 0  ;;  %s2072_s21 = smov 0   ;;  %s2074_s22 = smov 0  }
   0xd   :  { %s2076_s23 = smov 0   ;;  %s2078_s24 = smov 0  }
   0xe   :  { %s2080_s25 = smov 0   ;;  %s2082_s26 = smov 0  }
   0xf   :  { %s2084_s27 = smov 0   ;;  %s2086_s28 = smov 0  }
  0x10   :  { %s2088_s29 = smov 0   ;;  %s2090_s30 = smov 0  }
  0x11   :  { %s2092_s7 = smov 0   ;;  %s2094_s8 = smov 0  }
  0x12   :  { %s2096_s9 = smov 0  }
  0x13 LB: > { %2497 = sst [smem:[#allocation15_spill]] %s1993_s26  ;;  %s2478_s10 = sadd.s32 4294967295, %s2021_s9   ;;  %s2021_s9 = sphi %s2096_s9, %s25_s9   ;;  %s2017_s8 = sphi %s2094_s8, %s2548_s8   ;;  %s2013_s7 = sphi %s2092_s7, %s2539_s7   ;;  %s2009_s30 = sphi %s2090_s30, %s2547_s30   ;;  %s2005_s29 = sphi %s2088_s29, %s2537_s29   ;;  %s2001_s28 = sphi %s2086_s28, %s2536_s28   ;;  %s1997_s27 = sphi %s2084_s27, %s2546_s27   ;;  %s1993_s26 = sphi %s2082_s26, %s2535_s26   ;;  %s1989_s25 = sphi %s2080_s25, %s2545_s25   ;;  %s1985_s24 = sphi %s2078_s24, %s2544_s24   ;;  %s1981_s23 = sphi %s2076_s23, %s2543_s23   ;;  %s1977_s22 = sphi %s2074_s22, %s2542_s22   ;;  %s1973_s21 = sphi %s2072_s21, %s2541_s21  }
  0x14   : > { %2498 = sst [smem:[#allocation16_spill]] %s1997_s27  ;;  %s37_s11 = sadd.s32 1, %s2009_s30 }
  0x15   : > { %2499 = sst [smem:[#allocation17_spill]] %s2001_s28  ;;  %p38_p0 = scmp.ge.s32.totalorder %s37_s11, 2 }
  0x16   : > { %2500 = sst [smem:[#allocation18_spill]] %s2013_s7  ;;  %s40_s12 = sadd.s32 1, %s2013_s7 }
  0x17   : > { %2501 = sst [smem:[#allocation19_spill]] %s2017_s8  ;;  %s44_s13 = sadd.s32 1, %s2017_s8 }
  0x18   : > { %s77_s14 = sadd.s32 1, %s1993_s26  ;;  %s2550_s11 = smov (%p38_p0, %s37_s11), 0 }
  0x19   : > { %2502 = sst [smem:[#allocation20_spill]] %s2550_s11  ;;  %s2552_s12 = smov (!%p38_p0, %s40_s12), %s2013_s7 }
  0x1a   : > { %p84_p1 = scmp.ne.s32.totalorder %s1993_s26, %s1989_s25  ;;  %p85_p2 = scmp.eq.s32.totalorder %s2021_s9, 0 }
  0x1b   : > { %p42_p3 = scmp.ge.s32.totalorder %s2552_s12, 2  ;;  %p90_p4 = scmp.ne.s32.totalorder %s1989_s25, %s1985_s24 }
  0x1c   : > { %p2149_p5 = por %p85_p2, %p84_p1  ;;  %p2155_p6 = scmp.eq.s32.totalorder %s2478_s10, 0 }
  0x1d   : > { %s2554_s12 = smov (%p42_p3, %s2552_s12), 0  ;;  %s2556_s13 = smov (!%p42_p3, %s44_s13), %s2017_s8 }
  0x1e   : > { %2505 = sst [smem:[#allocation21_spill]] %s2554_s12  ;;  %s74_s17 = ssub.s32 %s2013_s7, %s2554_s12 }
  0x1f   : > { %p2166_p7 = por %p2155_p6, %p90_p4  ;;  %p46_p8 = scmp.ge.s32.totalorder %s2556_s13, 2 }
  0x20   : > { %p75_p9 = scmp.eq.s32.totalorder %s74_s17, 0  ;;  %s127_s19 = ssub.s32 %s2009_s30, %s2550_s11 }
  0x21   : > { %s131_s20 = sadd.s32 1, %s1981_s23  ;;  %s2558_s13 = smov (%p46_p8, %s2556_s13), 0 }
  0x22   : > { %2507 = sst [smem:[#allocation22_spill]] %s2558_s13  ;;  %s128_s10 = sor.u32 %s127_s19, %s74_s17 }
  0x23   : > { %s2176_s24 = scalar_select %p75_p9, %s1993_s26, %s77_s14  }
  0x24   : > { %p138_p10 = scmp.ne.s32.totalorder %s1981_s23, %s1977_s22  ;;  %p129_p11 = scmp.eq.s32.totalorder %s128_s10, 0 }
  0x25   : > { %2508 = sst [smem:[#allocation23_spill]] %s2176_s24  ;;  %p144_p12 = scmp.ne.s32.totalorder %s1977_s22, %s1973_s21 }
  0x26   : > { %p2184_p13 = por %p138_p10, %p85_p2  ;;  %p1612_p1 = scmp.lt.s32.totalorder %s2021_s9, 8 }
  0x27   : > { %s2189_s8 = scalar_select %p129_p11, %s1981_s23, %s131_s20  }
  0x28   : > { %p2193_p0 = por %p144_p12, %p2155_p6  ;;  %s2199_s14 = sand.u32 1, %s1993_s26  }
  0x29   : > { %2510 = sst [smem:[#allocation24_spill]] %s2189_s8  ;;  %s276_s17 = sand.u32 1, %s2021_s9  }
  0x2a   : > { %p2204_p3 = pnand %p1612_p1, %p2149_p5  ;;  %s1383_s10 = sshll.u32 %s2199_s14, 6 }
  0x2b   : > { %s1455_s19 = sshll.u32 %s2013_s7, 10  ;;  %s2513_s2 = sld [smem:[#allocation27_spill]] }
  0x2c   : > { %s280_s24 = scalar_lea.vmem [#allocation6], %s1383_s10  ;;  %p2215_p2 = pnand %p1612_p1, %p2184_p13 }
  0x2d   : > { %s287_s8 = sshll.u32 %s280_s24, 4  ;;  %s2219_s15 = scalar_lea.sflag [#allocation7], %s276_s17  ;;  %s288_s8 = int_to_ptr.vmem [resolvable:$true] %s287_s8 }
  0x2e   : > { %p1793_p4 = pneg %p2204_p3  ;;  %s1804_s6 = scalar_lea.vmem %s288_s8, 1024 }
  0x2f   : > { %p1805_p5 = scmp.ne.s32.totalorder %s288_s8, %s1804_s6  ;;  %s2023_s20 = smov [#allocation6]  }
  0x31   : > { %s286_s13 = scalar_lea.hbm %s2513_s2, %s1455_s19  ;;  %p1807_p6 = pnand %p1805_p5, %p1793_p4 }
  0x32   : > { %s1809_s19 = sshll.u32 %s2023_s20, 4  ;;  %s1810_s19 = int_to_ptr.vmem [resolvable:$false] %s1809_s19 }
  0x33   : > { %p1808_p8 = pneg %p1807_p6  ;;  %s1811_s24 = scalar_lea.vmem %s1810_s19, 2048 }
  0x34   : > { %p1812_p9 = scmp.lt.s32.totalorder %s288_s8, %s1810_s19  ;;  %p1813_p10 = scmp.lt.s32.totalorder %s1811_s24, %s1804_s6 }
  0x36   : > { %p1814_p11 = por %p1813_p10, %p1812_p9 }
  0x38   : > { %p1815_p12 = pnand %p1814_p11, %p1808_p8 }
  0x3a   : > { %1818 = shalt.err (!%p1815_p12)
}
  0x3b   : > { %s2486_s12 = smov 64   ;;  %s2488_s17 = smov 4  }
  0x3c   : > { %1605 = dma.hbm_to_vmem [thread:$0]  (!%p2204_p3), %s286_s13, 1024, %s288_s8, %s2219_s15, %s2486_s12, %s2486_s12, %s2488_s17  }
  0x3d   : > { %p1393_p13 = scmp.ge.s32.totalorder %s2021_s9, 1  ;;  %p347_p1 = scmp.lt.s32.totalorder %s2021_s9, 9 }
  0x3e   : > { %s1588_s10 = smul.u32 192, %s2199_s14  ;;  %s2516_s1 = sld [smem:[#allocation26_spill]] }
  0x3f   : > { %p2234_p5 = pnand %p1393_p13, %p347_p1  ;;  %s1589_s16 = smul.u32 3072, %s2013_s7 }
  0x40   : > { %s259_s2 = scalar_lea.vmem [#allocation4], %s1588_s10  ;;  %s299_s0 = sand.u32 1, %s1981_s23  }
  0x41   : > { %s266_s5 = sshll.u32 %s259_s2, 4  ;;  %s256_s27 = scalar_lea.sflag [#allocation5], %s2199_s14  ;;  %s267_s5 = int_to_ptr.vmem [resolvable:$true] %s266_s5 }
  0x42   : > { %s1832_s28 = scalar_lea.vmem %s267_s5, 3072  ;;  %s2026_s8 = smov [#allocation4]  }
  0x43   : > { %p1833_p6 = scmp.ne.s32.totalorder %s267_s5, %s1832_s28  ;;  %s1837_s13 = sshll.u32 %s2026_s8, 4  ;;  %s1838_s13 = int_to_ptr.vmem [resolvable:$false] %s1837_s13 }
  0x44   : > { %s265_s24 = scalar_lea.hbm %s2516_s1, %s1589_s16  ;;  %s1839_s12 = scalar_lea.vmem %s1838_s13, 6144 }
  0x45   : > { %p1835_p8 = pnand %p1833_p6, %p1793_p4  ;;  %p1840_p10 = scmp.lt.s32.totalorder %s267_s5, %s1838_s13 }
  0x46   : > { %p1841_p11 = scmp.lt.s32.totalorder %s1839_s12, %s1832_s28 }
  0x47   : > { %p1836_p9 = pneg %p1835_p8 }
  0x48   : > { %p1842_p12 = por %p1841_p11, %p1840_p10 }
  0x4a   : > { %p1843_p13 = pnand %p1842_p12, %p1836_p9 }
  0x4c   : > { %1846 = shalt.err (!%p1843_p13)
}
  0x4d   : > { %s2027_s10 = smov 192   ;;  %s2028_s2 = smov 12  }
  0x4e   : > { %1602 = dma.hbm_to_vmem [thread:$0]  (!%p2204_p3), %s265_s24, 3072, %s267_s5, %s256_s27, %s2027_s10, %s2027_s10, %s2028_s2  }
  0x4f   : > { %s1386_s14 = sshll.u32 %s299_s0, 6  ;;  %s1387_s16 = sshll.u32 %s2013_s7, 5 }
  0x50   : > { %s306_s20 = sadd.s32 %s2009_s30, %s1387_s16  ;;  %s301_s8 = scalar_lea.vmem [#allocation8], %s1386_s14 }
  0x51   : > { %s1388_s19 = sshll.u32 %s306_s20, 6  ;;  %s309_s28 = sshll.u32 %s301_s8, 4  ;;  %s310_s28 = int_to_ptr.vmem [resolvable:$true] %s309_s28 }
  0x52   : > { %s2517_s3 = sld [smem:[#allocation28_spill]]  ;;  %p1849_p4 = pneg %p2215_p2 }
  0x53   : > { %s1860_s1 = scalar_lea.vmem %s310_s28, 1024  ;;  %s2029_s5 = smov [#allocation8]  }
  0x54   : > { %p1861_p1 = scmp.ne.s32.totalorder %s310_s28, %s1860_s1  ;;  %s1865_s27 = sshll.u32 %s2029_s5, 4  ;;  %s1866_s27 = int_to_ptr.vmem [resolvable:$false] %s1865_s27 }
  0x55   : > { %s1867_s21 = scalar_lea.vmem %s1866_s27, 2048  ;;  %p1868_p8 = scmp.lt.s32.totalorder %s310_s28, %s1866_s27 }
  0x56   : > { %p1863_p6 = pnand %p1861_p1, %p1849_p4  ;;  %p1869_p9 = scmp.lt.s32.totalorder %s1867_s21, %s1860_s1 }
  0x58   : > { %s308_s17 = scalar_lea.hbm %s2517_s3, %s1388_s19  ;;  %p1864_p3 = pneg %p1863_p6 }
  0x59   : > { %p1870_p10 = por %p1869_p9, %p1868_p8 }
  0x5b   : > { %p1871_p11 = pnand %p1870_p10, %p1864_p3 }
  0x5d   : > { %1874 = shalt.err (!%p1871_p11)
}
  0x5e   : > { %s2030_s24 = smov 128   ;;  %s2518_s10 = smov 4  }
  0x5f   : > { %s2519_s2 = smov 64   ;;  %s1390_s20 = sshll.u32 %s2009_s30, 4 }
  0x60   : > { %1608 = dma.hbm_to_vmem [thread:$0]  (!%p2215_p2), %s308_s17, 1024, %s310_s28, %s2219_s15, %s2030_s24, %s2519_s2, %s2518_s10  }
  0x61   : > { %s329_s19 = sadd.s32 %s1390_s20, %s1387_s16  ;;  %s323_s8 = scalar_lea.vmem [#allocation9], %s1386_s14 }
  0x62   : > { %s332_s12 = sshll.u32 %s323_s8, 4  ;;  %s1392_s13 = sshll.u32 %s329_s19, 6  ;;  %s333_s12 = int_to_ptr.vmem [resolvable:$true] %s332_s12 }
  0x63   : > { %s331_s27 = scalar_lea.hbm %s2475_s4, %s1392_s13  ;;  %s320_s21 = scalar_lea.sflag [#allocation10], %s299_s0 }
  0x64   : > { %s1888_s3 = scalar_lea.vmem %s333_s12, 1024  ;;  %s2031_s7 = smov [#allocation9]  }
  0x65   : > { %p1889_p12 = scmp.ne.s32.totalorder %s333_s12, %s1888_s3  ;;  %s1893_s15 = sshll.u32 %s2031_s7, 4  ;;  %s1894_s15 = int_to_ptr.vmem [resolvable:$false] %s1893_s15 }
  0x66   : > { %s1895_s17 = scalar_lea.vmem %s1894_s15, 2048  ;;  %p1896_p6 = scmp.lt.s32.totalorder %s333_s12, %s1894_s15 }
  0x67   : > { %p1891_p13 = pnand %p1889_p12, %p1849_p4  ;;  %p1897_p3 = scmp.lt.s32.totalorder %s1895_s17, %s1888_s3 }
  0x69   : > { %p1892_p1 = pneg %p1891_p13  ;;  %p1898_p8 = por %p1897_p3, %p1896_p6 }
  0x6b   : > { %p1899_p9 = pnand %p1898_p8, %p1892_p1 }
  0x6d   : > { %1902 = shalt.err (!%p1899_p9)
}
  0x6e   : > { %1611 = dma.hbm_to_vmem [thread:$0]  (!%p2215_p2), %s331_s27, 1024, %s333_s12, %s320_s21, %s2519_s2, %s2519_s2, %s2518_s10  }
  0x6f   : > { %351 = sbr.rel (%p2234_p5) target bundleno = 2391 (0x957), region = 44  ;;  %s353_s0 = sand.u32 (!%p2234_p5), 1, %s1989_s25  }
  0x70   : > { %s1590_s7 = smul.u32 (!%p2234_p5), 192, %s353_s0  ;;  %s354_s14 = scalar_lea.sflag (!%p2234_p5), [#allocation5], %s353_s0 }
  0x72   : > { %s2284_s16 = scalar_lea.vmem (!%p2234_p5), [#allocation4], %s1590_s7 }
  0x74   : > { %1956 = dma.done.wait (%p2166_p7), %s354_s14, 3072  }
  0x75   : > { %1958 = vsyncadd (%p2166_p7), %s354_s14, 4294964224  ;;  %s2520_s3 = sadd.s32 4294967295, %s2021_s9   ;;  %s1394_s28 = sshll.u32 %s353_s0, 6 }
  0x76   : > { %s362_s26 = sand.u32 1, %s2520_s3   ;;  %s2292_s6 = scalar_lea.vmem [#allocation6], %s1394_s28 }
  0x77   : > { %s363_s24 = scalar_lea.sflag [#allocation7], %s362_s26 }
  0x78   : > { %1960 = dma.done.wait (%p2166_p7), %s363_s24, 1024  }
  0x79   : > { %1962 = vsyncadd (%p2166_p7), %s363_s24, 4294966272  ;;  %s373_s10 = sand.u32 1, %s1977_s22  }
  0x7a   : > { %s1395_s2 = sshll.u32 %s373_s10, 6 }
  0x7b   : > { %s2299_s20 = scalar_lea.vmem [#allocation8], %s1395_s2 }
  0x7c   : > { %1964 = dma.done.wait (%p2193_p0), %s363_s24, 1024  }
  0x7d   : > { %1966 = vsyncadd (%p2193_p0), %s363_s24, 4294966272  ;;  %s381_s19 = scalar_lea.sflag [#allocation10], %s373_s10  ;;  %s2305_s8 = scalar_lea.vmem [#allocation9], %s1395_s2 }
  0x7e   : > { %1968 = dma.done.wait (%p2193_p0), %s381_s19, 1024  }
  0x7f   : > { %1970 = vsyncadd (%p2193_p0), %s381_s19, 4294966272  ;;  %s2521_s18 = sld [smem:[#allocation17_spill]]  ;;  %p435_p7 = scmp.lt.s32.totalorder %s2005_s29, 1 }
  0x80   : > { %s2522_s12 = sld [smem:[#allocation16_spill]] }
  0x81   : > { %s2560_s29 = smov (!%p435_p7, %s2005_s29), 1  ;;  %s2523_s27 = sld [smem:[#allocation25_spill]] }
  0x82   : > { %s1397_s13 = sshll.u32 %s2560_s29, 2  ;;  %s2524_s0 = sld [smem:[#allocation29_spill]] }
  0x83   : > { %s2525_s26 = sld [smem:[#allocation30_spill]] }
  0x85   : > { %p440_p2 = scmp.lt.s32.totalorder %s2521_s18, 1  ;;  %p449_p5 = scmp.eq.s32.totalorder %s2521_s18, 0 }
  0x86   : > { %p450_p4 = scmp.eq.s32.totalorder %s2522_s12, 0 }
  0x87   : > { %s2562_s18 = smov (!%p440_p2, %s2521_s18), 1  ;;  %s438_s21 = scalar_lea.vmem %s2523_s27, %s1397_s13 }
  0x88   : > { %p451_p10 = pnand %p450_p4, %p449_p5  ;;  %s1398_s11 = sshll.u32 %s2562_s18, 2 }
  0x89   : > { %s2323_s7 = scalar_lea.vmem %s2524_s0, %s1398_s11  ;;  %s2328_s28 = scalar_lea.vmem %s2525_s26, %s1397_s13 }
  0x8a   : > { %454 = sbr.rel (%p451_p10) target bundleno = 147 (0x93), region = 64 }
  0x8f   : > { %v455_v0 = vld [vmem:[%s438_s21] sm:$0xf] }
  0x90   : > { %v456_v1 = vunpack.c.l.bf16 %v455_v0 }
  0x92   : > { %457 = vst [vmem:[#allocation2] sm:$0xff] %v456_v1 }
  0x93 PF: > { %s2526_s29 = sld [smem:[#allocation16_spill]] }
  0x99   : > { %p1400_p0 = scmp.ne.s32.totalorder %s2526_s29, 0 }
  0x9b   : > { %460 = sbr.rel (%p1400_p0) target bundleno = 1602 (0x642), region = 68 }
  0xa0   : > { %v1727_v2 = vld [vmem:[%s2284_s16 + $0xac] ss:$12 sps:$4 sm:$0xff]   ;;  %v1729_v3 = vld [vmem:[%s2284_s16 + $0xa8] ss:$12 sps:$4 sm:$0xff]   ;;  %v2032_v4 = vmov 0   ;;  %v2033_v5 = vmov 0.0  }
  0xa1   : > { %655 = vmatprep.mubr.bf16.mxu0 %v2032_v4  ;;  %1496 = vmatprep.subr.bf16.mxu1 %v2033_v5  ;;  %v1730_v6 = vld [vmem:[%s2284_s16 + $0x94] ss:$12 sps:$4 sm:$0xff]   ;;  %vm2034_vm0 = vmmov 0   ;;  %v1732_v7 = vld [vmem:[%s2284_s16 + $0x90] ss:$12 sps:$4 sm:$0xff]   ;;  %vm763_vm1 = vcmask 1043456  }
  0xa2   : > { %623 = vmatprep.subr.bf16.mxu0 %v1727_v2  ;;  %1512 = vmatprep.mubr.msk.bf16.mxu1 %vm2034_vm0, %v2033_v5  ;;  %v1733_v8 = vld [vmem:[%s2284_s16 + $0x7c] ss:$12 sps:$4 sm:$0xff]   ;;  %v1735_v9 = vld [vmem:[%s2284_s16 + $0x78] ss:$12 sps:$4 sm:$0xff]   ;;  %v1738_v11 = vld [vmem:[%s2284_s16 + $0x60] ss:$12 sps:$4 sm:$0xff]  }
  0xa3   : > { %624 = vmatpush1.bf16.msra.mxu0 %v1729_v3  ;;  %v1736_v10 = vld [vmem:[%s2284_s16 + $0x64] ss:$12 sps:$4 sm:$0xff]   ;;  %v1739_v13 = vld [vmem:[%s2284_s16 + $0x4c] ss:$12 sps:$4 sm:$0xff]   ;;  %v1741_v15 = vld [vmem:[%s2284_s16 + $0x48] ss:$12 sps:$4 sm:$0xff]  }
  0xa4   : > { %625 = vmatprep.subr.bf16.mxu0 %v1730_v6  ;;  %v1751_v12 = vld [vmem:[%s2284_s16 + $0xb0] ss:$12 sps:$4 sm:$0xff]   ;;  %v1752_v14 = vld [vmem:[%s2284_s16 + $0x98] ss:$12 sps:$4 sm:$0xff]   ;;  %v1742_v16 = vld [vmem:[%s2284_s16 + $0x34] ss:$12 sps:$4 sm:$0xff]  }
  0xa5   : > { %1497 = vmatpush3.bf16.msra.mxu1 %v1751_v12  ;;  %v1744_v17 = vld [vmem:[%s2284_s16 + $0x30] ss:$12 sps:$4 sm:$0xff]   ;;  %v1753_v18 = vld [vmem:[%s2284_s16 + $0x80] ss:$12 sps:$4 sm:$0xff]   ;;  %v1754_v20 = vld [vmem:[%s2284_s16 + $0x68] ss:$12 sps:$4 sm:$0xff]  }
  0xa6   : > { %1498 = vmatprep.subr.bf16.mxu1 %v2033_v5  ;;  %v1745_v19 = vld [vmem:[%s2284_s16 + $0x1c] ss:$12 sps:$4 sm:$0xff]   ;;  %v1747_v21 = vld [vmem:[%s2284_s16 + $0x18] ss:$12 sps:$4 sm:$0xff]   ;;  %v1750_v24 = vld [vmem:[%s2284_s16] ss:$12 sps:$4 sm:$0xff]  }
  0xa7   : > { %626 = vmatpush1.bf16.msra.mxu0 %v1732_v7  ;;  %v1748_v22 = vld [vmem:[%s2284_s16 + $0x4] ss:$12 sps:$4 sm:$0xff]   ;;  %v1757_v28 = vld [vmem:[%s2284_s16 + $0x20] ss:$12 sps:$4 sm:$0xff]   ;;  %v1758_v29 = vld [vmem:[%s2284_s16 + $0x8] ss:$12 sps:$4 sm:$0xff]  }
  0xa8   : > { %627 = vmatprep.subr.bf16.mxu0 %v1733_v8  ;;  %v1755_v23 = vld [vmem:[%s2284_s16 + $0x50] ss:$12 sps:$4 sm:$0xff]   ;;  %v1756_v26 = vld [vmem:[%s2284_s16 + $0x38] ss:$12 sps:$4 sm:$0xff]   ;;  %vm747_vm2 = vcmask 64512   ;;  %v1761_v54 = vld [vmem:[%s2292_s6 + $0x28] sm:$0xff]  }
  0xa9   : > { %1499 = vmatpush3.bf16.msra.mxu1 %v1752_v14  ;;  %v2361_v25 = vld [vmem:[#allocation2] sm:$0xff]  ;;  %v1759_v52 = vld [vmem:[%s2292_s6 + $0x38] sm:$0xff]   ;;  %v1762_v55 = vld [vmem:[%s2292_s6 + $0x20] sm:$0xff]  }
  0xaa   : > { %1500 = vmatprep.subr.bf16.mxu1 %v2033_v5  ;;  %v462_v27 = vpack.c.bf16 %v2361_v25, %v2361_v25  ;;  %v1760_v53 = vld [vmem:[%s2292_s6 + $0x30] sm:$0xff]   ;;  %v1763_v56 = vld [vmem:[%s2292_s6 + $0x18] sm:$0xff]   ;;  %v1765_v62 = vld [vmem:[%s2292_s6 + $0x8] sm:$0xff]  }
  0xab   : > { %628 = vmatpush1.bf16.msra.mxu0 %v1735_v9  ;;  %v1764_v61 = vld [vmem:[%s2292_s6 + $0x10] sm:$0xff]   ;;  %v1766_v63 = vld [vmem:[%s2292_s6] sm:$0xff]  }
  0xac   : > { %629 = vmatprep.subr.bf16.mxu0 %v1736_v10 }
  0xad   : > { %1501 = vmatpush3.bf16.msra.mxu1 %v1753_v18 }
  0xae   : > { %1502 = vmatprep.subr.bf16.mxu1 %v2033_v5 }
  0xaf   : > { %630 = vmatpush1.bf16.msra.mxu0 %v1738_v11 }
  0xb0   : > { %631 = vmatprep.subr.bf16.mxu0 %v1739_v13 }
  0xb1   : > { %1503 = vmatpush3.bf16.msra.mxu1 %v1754_v20  ;;  %v914_v20 = vld [vmem:[%s2323_s7] sm:$0xf] }
  0xb2   : > { %1504 = vmatprep.subr.bf16.mxu1 %v2033_v5 }
  0xb3   : > { %632 = vmatpush1.bf16.msra.mxu0 %v1741_v15 }
  0xb4   : > { %633 = vmatprep.subr.bf16.mxu0 %v1742_v16 }
  0xb5   : > { %1505 = vmatpush3.bf16.msra.mxu1 %v1755_v23 }
  0xb6   : > { %1506 = vmatprep.subr.bf16.mxu1 %v2033_v5 }
  0xb7   : > { %634 = vmatpush1.bf16.msra.mxu0 %v1744_v17  ;;  %v928_v17 = vlaneseq }
  0xb8   : > { %635 = vmatprep.subr.bf16.mxu0 %v1745_v19 }
  0xb9   : > { %1507 = vmatpush3.bf16.msra.mxu1 %v1756_v26  ;;  %v929_v18 = vshrl.u32 %v928_v17, 7 }
  0xba   : > { %1508 = vmatprep.subr.bf16.mxu1 %v2033_v5 }
  0xbb   : > { %636 = vmatpush1.bf16.msra.mxu0 %v1747_v21  ;;  %v930_v19 = vsub.s32 0, %v929_v18  ;;  %v935_v21 = vsub.s32 1, %v929_v18 }
  0xbc   : > { %637 = vmatprep.subr.bf16.mxu0 %v1748_v22 }
  0xbd   : > { %1509 = vmatpush3.bf16.msra.mxu1 %v1757_v28  ;;  %v931_v22 = vrot.slane %v914_v20, %v930_v19 }
  0xbe   : > { %1510 = vmatprep.subr.bf16.mxu1 %v2033_v5 }
  0xbf   : > { %638 = vmatpush1.bf16.msra.mxu0 %v1750_v24  ;;  %v936_v24 = vrot.slane %v914_v20, %v935_v21 }
  0xc0   : > { %1528 = vmatprep.subr.bf16.mxu0 %v2033_v5 }
  0xc1   : > { %1511 = vmatpush3.bf16.msra.mxu1 %v1758_v29 }
  0xc2   : > { %656 = vmatmul.mubr.bf16.vlgmr.msra.gmra.mxu0 %v462_v27  ;;  %1516 = vmatprep.subr.bf16.mxu1 %v2033_v5 }
  0xc3   : > { %1544 = vmatprep.mubr.msk.bf16.mxu0 %vm2034_vm0, %v2033_v5  ;;  %1529 = vmatpush3.bf16.msra.mxu0 %v1759_v52 }
  0xc4   : > { %1513 = vmatmul.mubr.bf16.vlgmr.msra.gmra.mxu1 %v462_v27  ;;  %1530 = vmatprep.subr.bf16.mxu0 %v2033_v5 }
  0xc5   : > { %1518 = vmatprep.mubr.msk.bf16.mxu1 %vm2034_vm0, %v2033_v5 }
  0xc7   : > { %1531 = vmatpush3.bf16.msra.mxu0 %v1760_v53 }
  0xc8   : > { %1532 = vmatprep.subr.bf16.mxu0 %v2033_v5 }
  0xcb   : > { %1533 = vmatpush3.bf16.msra.mxu0 %v1761_v54 }
  0xcc   : > { %1534 = vmatprep.subr.bf16.mxu0 %v2033_v5 }
  0xcf   : > { %1535 = vmatpush3.bf16.msra.mxu0 %v1762_v55 }
  0xd0   : > { %1536 = vmatprep.subr.bf16.mxu0 %v2033_v5 }
  0xd3   : > { %1537 = vmatpush3.bf16.msra.mxu0 %v1763_v56 }
  0xd4   : > { %1538 = vmatprep.subr.bf16.mxu0 %v2033_v5 }
  0xd7   : > { %1539 = vmatpush3.bf16.msra.mxu0 %v1764_v61 }
  0xd8   : > { %1540 = vmatprep.subr.bf16.mxu0 %v2033_v5 }
  0xdb   : > { %1541 = vmatpush3.bf16.msra.mxu0 %v1765_v62 }
  0xdc   : > { %1542 = vmatprep.subr.bf16.mxu0 %v2033_v5 }
  0xdf   : > { %1543 = vmatpush3.bf16.msra.mxu0 %v1766_v63 }
 0x182   : > { %v657_v30 = vpop.f32.mrf.mxu0 }
 0x183   : > { %v706_v35 = vpack.c.bf16 %v657_v30, %v657_v30 }
 0x184   : > { %v659_v31 = vpop.f32.mrf.mxu0  ;;  %v698_v36 = vpop.f32.mrf.mxu1 }
 0x185   : > { %v704_v32 = vpack.c.bf16 %v659_v31, %v659_v31  ;;  %v705_v37 = vpack.c.bf16 %v698_v36, %v698_v36 }
 0x186   : > { %v661_v33 = vpop.f32.mrf.mxu0  ;;  %v1514_v38 = vpop.f32.mrf.mxu1 }
 0x187   : > { %1517 = vmatpush3.bf16.xpose.msra.mxu1 %v704_v32  ;;  %v765_v39 = vsel %vm763_vm1, %v705_v37, 0 }
 0x188   : > { %v662_v34 = vpop.f32.mrf.mxu0  ;;  %1522 = vmatprep.subr.bf16.mxu1 %v2033_v5  ;;  %v701_v40 = vpop.f32.mrf.mxu1 }
 0x18a   : > { %v1515_v41 = vpop.f32.mrf.mxu1 }
 0x18e   : > { %1519 = vmatmul.mubr.bf16.vlgmr.msra.gmra.mxu1 %v706_v35 }
 0x18f   : > { %1524 = vmatprep.mubr.msk.bf16.mxu1 %vm2034_vm0, %v2033_v5  ;;  %1523 = vmatpush3.bf16.msra.mxu1 %v765_v39 }
 0x24e   : > { %v741_v42 = vpop.f32.mrf.mxu1 }
 0x24f   : > { %v748_v43 = vsel %vm747_vm2, %v741_v42, -inf }
 0x250   : > { %749 = vmax.xlane.f32.xlu0 %v748_v43  ;;  %v1520_v44 = vpop.f32.mrf.mxu1 }
 0x252   : > { %v744_v45 = vpop.f32.mrf.mxu1 }
 0x254   : > { %v1521_v46 = vpop.f32.mrf.mxu1 }
 0x2d9   : > { %v750_v47 = vpop.xlane.xlu0 %749 }
 0x2da   : > { %v751_v48 = vsub.f32 %v741_v42, %v750_v47 }
 0x2dc   : > { %v752_v49 = vmul.f32 1.442695, %v751_v48 }
 0x2de   : > { %1767 = vpow2.f32 %v752_v49 }
 0x2eb   : > { %v1768_v50 = vpop.eup %1767 }
 0x2ec   : > { %v754_v51 = vsel %vm747_vm2, %v1768_v50, 0.0 }
 0x2ed   : > { %755 = vadd.xlane.f32.xlu0 %v754_v51 }
 0x376   : > { %v756_v57 = vpop.xlane.xlu0 %755 }
 0x377   : > { %1769 = vrcp.f32 %v756_v57 }
 0x384   : > { %v1770_v58 = vpop.eup %1769 }
 0x385   : > { %v758_v59 = vmul.f32 %v1770_v58, %v1768_v50 }
 0x387   : > { %v759_v60 = vpack.c.bf16 %v758_v59, %v758_v59 }
 0x389   : > { %1525 = vmatmul.mubr.msk.bf16.vlgmr.msra.gmra.mxu1 %vm747_vm2, %v759_v60 }
 0x449   : > { %v801_v0 = vpop.f32.mrf.mxu1 }
 0x44a   : > { %807 = vst [vmem:[#allocation3] sm:$0xff] %v801_v0  ;;  %v809_v1 = vpack.c.bf16 %v801_v0, %v801_v0 }
 0x44b   : > { %v1526_v2 = vpop.f32.mrf.mxu1 }
 0x44c   : > { %1545 = vmatmul.mubr.bf16.vlgmr.msra.gmra.mxu0 %v809_v1 }
 0x44d   : > { %v804_v3 = vpop.f32.mrf.mxu1 }
 0x44f   : > { %v1527_v4 = vpop.f32.mrf.mxu1 }
 0x50c   : > { %v908_v6 = vpop.f32.mrf.mxu0 }
 0x50d   : > { %v915_v7 = vadd.f32 %v908_v6, %v2361_v25 }
 0x50e   : > { %v1546_v8 = vpop.f32.mrf.mxu0 }
 0x50f   : > { %916 = vadd.xlane.f32.xlu1 %v915_v7 }
 0x510   : > { %v911_v9 = vpop.f32.mrf.mxu0 }
 0x512   : > { %v1547_v10 = vpop.f32.mrf.mxu0 }
 0x598   : > { %v917_v11 = vpop.xlane.xlu1 %916 }
 0x599   : > { %v919_v12 = vmul.f32 0.0078125, %v917_v11 }
 0x59b   : > { %v920_v5 = vsub.f32 %v915_v7, %v919_v12 }
 0x59d   : > { %v921_v13 = vmul.f32 %v920_v5, %v920_v5 }
 0x59f   : > { %922 = vadd.xlane.f32.xlu1 %v921_v13 }
 0x628   : > { %v923_v14 = vpop.xlane.xlu1 %922 }
 0x629   : > { %v924_v15 = vmul.f32 0.0078125, %v923_v14 }
 0x62b   : > { %v925_v16 = vadd.f32 1e-05, %v924_v15 }
 0x62d   : > { %1771 = vrsqrt.f32 %v925_v16 }
 0x63a   : > { %v1772_v23 = vpop.eup %1771 }
 0x63b   : > { %v927_v25 = vmul.f32 %v1772_v23, %v920_v5 }
 0x63d   : > { %v932_v26 = vmul.f32 %v931_v22, %v927_v25 }
 0x63f   : > { %v937_v27 = vadd.f32 %v936_v24, %v932_v26 }
 0x641   : > { %938 = vst [vmem:[#allocation2] sm:$0xff] %v937_v27 }
 0x642 PF: > { %v1773_v28 = vld [vmem:[%s2299_s20 + $0x38] sm:$0xff]   ;;  %v2035_v29 = vmov 0.0   ;;  %v1774_v30 = vld [vmem:[%s2299_s20 + $0x30] sm:$0xff]   ;;  %vm2036_vm3 = vmmov 0   ;;  %v1775_v31 = vld [vmem:[%s2299_s20 + $0x28] sm:$0xff]  }
 0x643   : > { %1548 = vmatprep.subr.bf16.mxu0 %v2035_v29  ;;  %1568 = vmatprep.subr.bf16.mxu1 %v2035_v29  ;;  %v1781_v32 = vld [vmem:[%s2305_s8 + $0x38] sm:$0xff]   ;;  %v1776_v33 = vld [vmem:[%s2299_s20 + $0x20] sm:$0xff]   ;;  %v1782_v34 = vld [vmem:[%s2305_s8 + $0x30] sm:$0xff]  }
 0x644   : > { %1549 = vmatpush3.bf16.msra.mxu0 %v1773_v28  ;;  %1564 = vmatprep.mubr.msk.bf16.mxu0 %vm2036_vm3, %v2035_v29  ;;  %v1777_v35 = vld [vmem:[%s2299_s20 + $0x18] sm:$0xff]   ;;  %v1783_v36 = vld [vmem:[%s2305_s8 + $0x28] sm:$0xff]   ;;  %v1778_v37 = vld [vmem:[%s2299_s20 + $0x10] sm:$0xff]  }
 0x645   : > { %1550 = vmatprep.subr.bf16.mxu0 %v2035_v29  ;;  %1584 = vmatprep.mubr.msk.bf16.mxu1 %vm2036_vm3, %v2035_v29  ;;  %v1784_v38 = vld [vmem:[%s2305_s8 + $0x20] sm:$0xff]   ;;  %v1779_v39 = vld [vmem:[%s2299_s20 + $0x8] sm:$0xff]   ;;  %v1785_v40 = vld [vmem:[%s2305_s8 + $0x18] sm:$0xff]  }
 0x646   : > { %1569 = vmatpush3.bf16.msra.mxu1 %v1781_v32  ;;  %v1780_v41 = vld [vmem:[%s2299_s20] sm:$0xff]   ;;  %v1786_v43 = vld [vmem:[%s2305_s8 + $0x10] sm:$0xff]   ;;  %v1787_v45 = vld [vmem:[%s2305_s8 + $0x8] sm:$0xff]  }
 0x647   : > { %1570 = vmatprep.subr.bf16.mxu1 %v2035_v29  ;;  %v1788_v46 = vld [vmem:[%s2305_s8] sm:$0xff]  }
 0x648   : > { %1551 = vmatpush3.bf16.msra.mxu0 %v1774_v30  ;;  %v939_v42 = vld [vmem:[#allocation2] sm:$0xff] }
 0x649   : > { %1552 = vmatprep.subr.bf16.mxu0 %v2035_v29  ;;  %v940_v44 = vpack.c.bf16 %v939_v42, %v939_v42 }
 0x64a   : > { %1571 = vmatpush3.bf16.msra.mxu1 %v1782_v34 }
 0x64b   : > { %1572 = vmatprep.subr.bf16.mxu1 %v2035_v29 }
 0x64c   : > { %1553 = vmatpush3.bf16.msra.mxu0 %v1775_v31 }
 0x64d   : > { %1554 = vmatprep.subr.bf16.mxu0 %v2035_v29 }
 0x64e   : > { %1573 = vmatpush3.bf16.msra.mxu1 %v1783_v36 }
 0x64f   : > { %1574 = vmatprep.subr.bf16.mxu1 %v2035_v29 }
 0x650   : > { %1555 = vmatpush3.bf16.msra.mxu0 %v1776_v33 }
 0x651   : > { %1556 = vmatprep.subr.bf16.mxu0 %v2035_v29 }
 0x652   : > { %1575 = vmatpush3.bf16.msra.mxu1 %v1784_v38 }
 0x653   : > { %1576 = vmatprep.subr.bf16.mxu1 %v2035_v29 }
 0x654   : > { %1557 = vmatpush3.bf16.msra.mxu0 %v1777_v35 }
 0x655   : > { %1558 = vmatprep.subr.bf16.mxu0 %v2035_v29 }
 0x656   : > { %1577 = vmatpush3.bf16.msra.mxu1 %v1785_v40 }
 0x657   : > { %1578 = vmatprep.subr.bf16.mxu1 %v2035_v29 }
 0x658   : > { %1559 = vmatpush3.bf16.msra.mxu0 %v1778_v37 }
 0x659   : > { %1560 = vmatprep.subr.bf16.mxu0 %v2035_v29 }
 0x65a   : > { %1579 = vmatpush3.bf16.msra.mxu1 %v1786_v43 }
 0x65b   : > { %1580 = vmatprep.subr.bf16.mxu1 %v2035_v29 }
 0x65c   : > { %1561 = vmatpush3.bf16.msra.mxu0 %v1779_v39 }
 0x65d   : > { %1562 = vmatprep.subr.bf16.mxu0 %v2035_v29 }
 0x65e   : > { %1581 = vmatpush3.bf16.msra.mxu1 %v1787_v45 }
 0x65f   : > { %1582 = vmatprep.subr.bf16.mxu1 %v2035_v29 }
 0x660   : > { %1563 = vmatpush3.bf16.msra.mxu0 %v1780_v41 }
 0x662   : > { %1583 = vmatpush3.bf16.msra.mxu1 %v1788_v46 }
 0x663   : > { %1565 = vmatmul.mubr.bf16.vlgmr.msra.gmra.mxu0 %v940_v44 }
 0x723   : > { %v1039_v47 = vpop.f32.mrf.mxu0 }
 0x724   : > { %v1045_v48 = vmax.f32 %v1039_v47, 0.0 }
 0x725   : > { %v1566_v49 = vpop.f32.mrf.mxu0 }
 0x726   : > { %v1046_v50 = vpack.c.bf16 %v1045_v48, %v1045_v48 }
 0x727   : > { %v1042_v51 = vpop.f32.mrf.mxu0 }
 0x728   : > { %1585 = vmatmul.mubr.bf16.vlgmr.msra.gmra.mxu1 %v1046_v50 }
 0x729   : > { %v1567_v52 = vpop.f32.mrf.mxu0 }
 0x7e8   : > { %v1145_v53 = vpop.f32.mrf.mxu1 }
 0x7ea   : > { %v1586_v54 = vpop.f32.mrf.mxu1  ;;  %1153 = sbr.rel (%p1400_p0) target bundleno = 2032 (0x7f0), region = 72 }
 0x7ec   : > { %v1148_v55 = vpop.f32.mrf.mxu1 }
 0x7ee   : > { %v1587_v56 = vpop.f32.mrf.mxu1 }
 0x7ef   : > { %1154 = vst [vmem:[#allocation3] sm:$0xff] %v1145_v53 }
 0x7f0 PF: > { %s2528_s24 = sld [smem:[#allocation16_spill]] }
 0x7f6   : > { %p1451_p11 = scmp.le.s32.totalorder %s2528_s24, 0 }
 0x7f8   : > { %1158 = sbr.rel (%p1451_p11) target bundleno = 2049 (0x801), region = 76 }
 0x7fd   : > { %v1159_v57 = vld [vmem:[#allocation3] sm:$0xff] }
 0x7fe   : > { %v1160_v58 = vadd.f32 %v1159_v57, %v1145_v53 }
 0x800   : > { %1161 = vst [vmem:[#allocation3] sm:$0xff] %v1160_v58 }
 0x801 PF: > { %s2529_s6 = sld [smem:[#allocation16_spill]] }
 0x807   : > { %p1162_p12 = scmp.eq.s32.totalorder %s2529_s6, 1  ;;  %p1452_p13 = scmp.ne.s32.totalorder %s2529_s6, 1 }
 0x809   : > { %1165 = sbr.rel (%p1452_p13) target bundleno = 2372 (0x944), region = 80 }
 0x80e   : > { %v1167_v59 = vld [vmem:[#allocation2] sm:$0xff]  ;;  %v1168_v60 = vld [vmem:[#allocation3] sm:$0xff]  ;;  %v1182_v6 = vlaneseq }
 0x80f   : > { %v1169_v61 = vadd.f32 %v1168_v60, %v1167_v59  ;;  %v1166_v9 = vld [vmem:[%s2323_s7] sm:$0xf] }
 0x810   : > { %v1183_v7 = vshrl.u32 %v1182_v6, 7 }
 0x811   : > { %1170 = vadd.xlane.f32.xlu0 %v1169_v61 }
 0x812   : > { %v1184_v8 = vsub.s32 2, %v1183_v7  ;;  %v1189_v10 = vsub.s32 3, %v1183_v7 }
 0x814   : > { %v1185_v11 = vrot.slane %v1166_v9, %v1184_v8  ;;  %v1190_v13 = vrot.slane %v1166_v9, %v1189_v10 }
 0x89a   : > { %v1171_v62 = vpop.xlane.xlu0 %1170 }
 0x89b   : > { %v1173_v63 = vmul.f32 0.0078125, %v1171_v62 }
 0x89d   : > { %v1174_v0 = vsub.f32 %v1169_v61, %v1173_v63 }
 0x89f   : > { %v1175_v1 = vmul.f32 %v1174_v0, %v1174_v0 }
 0x8a1   : > { %1176 = vadd.xlane.f32.xlu0 %v1175_v1 }
 0x92a   : > { %v1177_v2 = vpop.xlane.xlu0 %1176 }
 0x92b   : > { %v1178_v3 = vmul.f32 0.0078125, %v1177_v2 }
 0x92d   : > { %v1179_v4 = vadd.f32 1e-05, %v1178_v3 }
 0x92f   : > { %1789 = vrsqrt.f32 %v1179_v4 }
 0x93c   : > { %v1790_v12 = vpop.eup %1789 }
 0x93d   : > { %v1181_v5 = vmul.f32 %v1790_v12, %v1174_v0 }
 0x93f   : > { %v1186_v14 = vmul.f32 %v1185_v11, %v1181_v5 }
 0x941   : > { %v1191_v15 = vadd.f32 %v1190_v13, %v1186_v14 }
 0x943   : > { %1192 = vst [vmem:[#allocation2] sm:$0xff] %v1191_v15 }
 0x944 PF: > { %s2530_s10 = sld [smem:[#allocation17_spill]] }
 0x94a   : > { %p1193_p1 = scmp.eq.s32.totalorder %s2530_s10, 1 }
 0x94c   : > { %p1194_p6 = pnand %p1193_p1, %p1162_p12 }
 0x94e   : > { %1197 = sbr.rel (%p1194_p6) target bundleno = 2391 (0x957), region = 84 }
 0x953   : > { %v1198_v16 = vld [vmem:[#allocation2] sm:$0xff] }
 0x954   : > { %v1199_v17 = vpack.c.bf16 %v1198_v16, %v1198_v16 }
 0x956   : > { %1200 = vst [vmem:[%s2328_s28] sm:$0xf] %v1199_v17 }
 0x957 PF: > { %s25_s9 = sadd.s32 1, %s2021_s9   ;;  %s2533_s19 = sld [smem:[#allocation24_spill]] }
 0x958   : > { %p2427_p3 = scmp.ge.s32.totalorder %s25_s9, 10   ;;  %s2534_s8 = sld [smem:[#allocation15_spill]] }
 0x959   : > { %s2535_s26 = sld [smem:[#allocation23_spill]]  ;;  %s2541_s21 = smov %s1977_s22 }
 0x95a   : > { %s2536_s28 = sld [smem:[#allocation18_spill]]  ;;  %s2542_s22 = smov %s1981_s23 }
 0x95b   : > { %s2537_s29 = sld [smem:[#allocation19_spill]]  ;;  %s2544_s24 = smov %s1989_s25 }
 0x95c   : > { %s2538_s18 = sld [smem:[#allocation20_spill]]  ;;  %s2546_s27 = smov %s2009_s30 }
 0x95d   : > { %s2539_s7 = sld [smem:[#allocation21_spill]]  ;;  %s2543_s23 = smov %s2533_s19 }
 0x95e   : > { %s2540_s12 = sld [smem:[#allocation22_spill]]  ;;  %s2545_s25 = smov %s2534_s8 }
 0x960   :  { %24 = sbr.rel (!%p2427_p3) target bundleno = 19 (0x13), region = 151 }
 0x962   : > { %s2547_s30 = smov %s2538_s18 }
 0x964   : > { %s2548_s8 = smov %s2540_s12 }
 0x965   :  { %1220 = vsyncpa [#allocation5], 1 }
 0x966   :  { %1222 = vsyncpa [#allocation5 + $0x1], 1 }
 0x967   :  { %1223 = vsyncpa [#allocation7], 1 }
 0x968   :  { %1225 = vsyncpa [#allocation7 + $0x1], 1 }
 0x969   :  { %1226 = vsyncpa [#allocation10], 1 }
 0x96a   :  { %1228 = vsyncpa [#allocation10 + $0x1], 1 }

</bundles_post_ra>
